<compile_context>
chip_gen: v5e
topology: v5e:2x2
jax: 0.10.0
libtpu: 0.0.40
codegen_flags: <defaults>
</compile_context>

<pallas_src>
import jax
import jax.numpy as jnp
from jax.experimental import pallas as pl
from jax.experimental.pallas import tpu as pltpu

# ---------------- config (small, consistent with the module's forward) -------
VOCAB = 256          # stands in for 21128
MAXPOS = 32
HID = 64             # stands in for 768
NHEAD = 4
DHEAD = HID // NHEAD
NLAYER = 2
FFN = 4 * HID
LN_EPS = 1e-5


# ---------------- in-kernel helpers -------------------------------------------
def _gelu_tanh(x):
    # GPT-2 "gelu_new" (tanh approximation)
    c = jnp.sqrt(2.0 / jnp.pi).astype(x.dtype)
    return 0.5 * x * (1.0 + jnp.tanh(c * (x + 0.044715 * x * x * x)))


def _layernorm(x, g, b):
    mu = jnp.mean(x, axis=-1, keepdims=True)
    var = jnp.mean((x - mu) ** 2, axis=-1, keepdims=True)
    return (x - mu) * jax.lax.rsqrt(var + LN_EPS) * g + b


# ---------------- fused transformer block kernel ------------------------------
def _block_kernel(h_ref, ln1g_ref, ln1b_ref, wqkv_ref, bqkv_ref,
                  wproj_ref, bproj_ref, ln2g_ref, ln2b_ref,
                  wfc_ref, bfc_ref, wout_ref, bout_ref, o_ref):
    h = h_ref[0].astype(jnp.float32)                       # (S, H)
    S = h.shape[0]

    # --- attention sub-block -------------------------------------------------
    x = _layernorm(h, ln1g_ref[...], ln1b_ref[...])
    qkv = (jnp.dot(x, wqkv_ref[...], preferred_element_type=jnp.float32)
           + bqkv_ref[...])                                # (S, 3H)

    scale = jnp.float32(1.0 / (DHEAD ** 0.5))
    row = jax.lax.broadcasted_iota(jnp.int32, (S, S), 0)
    col = jax.lax.broadcasted_iota(jnp.int32, (S, S), 1)
    causal = col <= row

    parts = []
    for hh in range(NHEAD):                                # static unrolled loop
        q = qkv[:, hh * DHEAD:(hh + 1) * DHEAD]            # (S, Dh)
        k = qkv[:, HID + hh * DHEAD: HID + (hh + 1) * DHEAD]
        v = qkv[:, 2 * HID + hh * DHEAD: 2 * HID + (hh + 1) * DHEAD]
        s = jnp.dot(q, k.T, preferred_element_type=jnp.float32) * scale  # (S, S)
        s = jnp.where(causal, s, jnp.float32(-1e30))
        s = s - jnp.max(s, axis=-1, keepdims=True)
        p = jnp.exp(s)
        p = p * pl.reciprocal(jnp.sum(p, axis=-1, keepdims=True), approx=True)
        parts.append(jnp.dot(p, v, preferred_element_type=jnp.float32))  # (S, Dh)
    attn = jnp.concatenate(parts, axis=-1)                 # lane-dense (S, H)

    h = h + (jnp.dot(attn, wproj_ref[...], preferred_element_type=jnp.float32)
             + bproj_ref[...])                             # fused residual

    # --- MLP sub-block -------------------------------------------------------
    x = _layernorm(h, ln2g_ref[...], ln2b_ref[...])
    y = _gelu_tanh(jnp.dot(x, wfc_ref[...], preferred_element_type=jnp.float32)
                   + bfc_ref[...])
    h = h + (jnp.dot(y, wout_ref[...], preferred_element_type=jnp.float32)
             + bout_ref[...])                              # fused residual

    o_ref[0] = h.astype(o_ref.dtype)


def transformer_block(h, lyr):
    """One fused GPT-2 block: h (B, S, H) -> (B, S, H)."""
    B, S, H = h.shape

    def full(shape):
        return pl.BlockSpec(shape, lambda b: (0, 0))

    in_specs = [
        pl.BlockSpec((1, S, H), lambda b: (b, 0, 0)),      # hidden state
        full((1, H)), full((1, H)),                        # ln1 gamma/beta
        full((H, 3 * H)), full((1, 3 * H)),                # qkv
        full((H, H)), full((1, H)),                        # proj
        full((1, H)), full((1, H)),                        # ln2 gamma/beta
        full((H, FFN)), full((1, FFN)),                    # fc
        full((FFN, H)), full((1, H)),                      # out
    ]
    return pl.pallas_call(
        _block_kernel,
        out_shape=jax.ShapeDtypeStruct((B, S, H), jnp.float32),
        grid_spec=pl.GridSpec(
            grid=(B,),
            in_specs=in_specs,
            out_specs=pl.BlockSpec((1, S, H), lambda b: (b, 0, 0)),
        ),
        compiler_params=pltpu.CompilerParams(
            dimension_semantics=("parallel",)),
    )(
        h,
        lyr["ln1_g"].reshape(1, H), lyr["ln1_b"].reshape(1, H),
        lyr["w_qkv"], lyr["b_qkv"].reshape(1, 3 * H),
        lyr["w_proj"], lyr["b_proj"].reshape(1, H),
        lyr["ln2_g"].reshape(1, H), lyr["ln2_b"].reshape(1, H),
        lyr["w_fc"], lyr["b_fc"].reshape(1, FFN),
        lyr["w_out"], lyr["b_out"].reshape(1, H),
    )


# ---------------- fused final LayerNorm + lm_head (no bias) -------------------
def _lm_head_kernel(x_ref, g_ref, b_ref, w_ref, o_ref):
    x = _layernorm(x_ref[...].astype(jnp.float32), g_ref[...], b_ref[...])
    o_ref[...] = jnp.dot(x, w_ref[...],
                         preferred_element_type=jnp.float32).astype(o_ref.dtype)


def lm_head(h2d, lnf_g, lnf_b, w_lm, *, tn=128):
    """logits = LayerNorm(h2d) @ w_lm  (no bias).  Tiled over vocab (lanes)."""
    M, H = h2d.shape
    _, N = w_lm.shape
    return pl.pallas_call(
        _lm_head_kernel,
        out_shape=jax.ShapeDtypeStruct((M, N), jnp.float32),
        grid_spec=pl.GridSpec(
            grid=(N // tn,),
            in_specs=[
                pl.BlockSpec((M, H), lambda j: (0, 0)),
                pl.BlockSpec((1, H), lambda j: (0, 0)),
                pl.BlockSpec((1, H), lambda j: (0, 0)),
                pl.BlockSpec((H, tn), lambda j: (0, j)),
            ],
            out_specs=pl.BlockSpec((M, tn), lambda j: (0, j)),
        ),
        compiler_params=pltpu.CompilerParams(
            dimension_semantics=("parallel",)),
    )(h2d, lnf_g.reshape(1, H), lnf_b.reshape(1, H), w_lm)


# ---------------- GPT-2 forward -----------------------------------------------
def gpt2_forward(params, token_inputs):
    B, S = token_inputs.shape
    # token + position embeddings (gather is glue)
    h = jnp.take(params["wte"], token_inputs, axis=0) + params["wpe"][:S][None, :, :]

    # TODO(synk): the PyTorch code instantiates Dropout(0.1) inline (training
    #             mode); stochastic dropout is modeled as eval-mode identity.

    for lyr in params["layers"]:
        h = transformer_block(h, lyr)

    # final layernorm + lm_head (Linear(768, 21128, bias=False)), fused
    logits = lm_head(h.reshape(B * S, HID),
                     params["lnf_g"], params["lnf_b"], params["w_lm"])
    return logits.reshape(B, S, VOCAB)


# ---------------- deterministic parameter init --------------------------------
def init_params(key):
    def nrm(key, shape, scale=0.02):
        return scale * jax.random.normal(key, shape, dtype=jnp.float32)

    keys = iter(jax.random.split(key, 8 + NLAYER * 12))
    params = {
        "wte": nrm(next(keys), (VOCAB, HID)),
        "wpe": nrm(next(keys), (MAXPOS, HID)),
        "lnf_g": jnp.ones((HID,), jnp.float32),
        "lnf_b": jnp.zeros((HID,), jnp.float32),
        "w_lm": nrm(next(keys), (HID, VOCAB)),
        "layers": [],
    }
    for _ in range(NLAYER):
        params["layers"].append({
            "ln1_g": jnp.ones((HID,), jnp.float32),
            "ln1_b": jnp.zeros((HID,), jnp.float32),
            "w_qkv": nrm(next(keys), (HID, 3 * HID)),
            "b_qkv": nrm(next(keys), (3 * HID,)),
            "w_proj": nrm(next(keys), (HID, HID)),
            "b_proj": nrm(next(keys), (HID,)),
            "ln2_g": jnp.ones((HID,), jnp.float32),
            "ln2_b": jnp.zeros((HID,), jnp.float32),
            "w_fc": nrm(next(keys), (HID, FFN)),
            "b_fc": nrm(next(keys), (FFN,)),
            "w_out": nrm(next(keys), (FFN, HID)),
            "b_out": nrm(next(keys), (HID,)),
        })
    return params


if __name__ == "__main__":
    key = jax.random.PRNGKey(0)
    pkey, tkey = jax.random.split(key)
    params = init_params(pkey)

    B, S = 2, 8
    token_inputs = jax.random.randint(tkey, (B, S), 0, VOCAB, dtype=jnp.int32)

    logits = jax.jit(gpt2_forward)(params, token_inputs)
    logits = jax.block_until_ready(logits)

    assert logits.shape == (B, S, VOCAB), logits.shape
    assert bool(jnp.all(jnp.isfinite(logits)))
    print("KERNEL_OK")
</pallas_src>

<mosaic_0001>
module attributes {stable_mosaic.version = 11 : i64} {
  func.func @_lm_head_kernel(%arg0: i32, %arg1: memref<16x64xf32, #tpu.memory_space<vmem>>, %arg2: memref<1x64xf32, #tpu.memory_space<vmem>>, %arg3: memref<1x64xf32, #tpu.memory_space<vmem>>, %arg4: memref<64x128xf32, #tpu.memory_space<vmem>>, %arg5: memref<16x128xf32, #tpu.memory_space<vmem>>) attributes {dimension_semantics = [#tpu.dimension_semantics<parallel>], iteration_bounds = array<i64: 2>, scalar_prefetch = 0 : i64, scratch_operands = 0 : i64, tpu.core_type = #tpu.core_type<tc>, window_params = [{pipeline_mode = #tpu.pipeline_mode<synchronous>, transform_indices = @transform_0, window_bounds = array<i64: 16, 64>}, {pipeline_mode = #tpu.pipeline_mode<synchronous>, transform_indices = @transform_1, window_bounds = array<i64: 1, 64>}, {pipeline_mode = #tpu.pipeline_mode<synchronous>, transform_indices = @transform_2, window_bounds = array<i64: 1, 64>}, {transform_indices = @transform_3, window_bounds = array<i64: 64, 128>}, {transform_indices = @transform_4, window_bounds = array<i64: 16, 128>}]} {
    %c0 = arith.constant 0 : index
    %c0_0 = arith.constant 0 : index
    %0 = vector.load %arg1[%c0, %c0_0] : memref<16x64xf32, #tpu.memory_space<vmem>>, vector<16x64xf32>
    %c0_1 = arith.constant 0 : index
    %c0_2 = arith.constant 0 : index
    %1 = vector.load %arg2[%c0_1, %c0_2] : memref<1x64xf32, #tpu.memory_space<vmem>>, vector<1x64xf32>
    %c0_3 = arith.constant 0 : index
    %c0_4 = arith.constant 0 : index
    %2 = vector.load %arg3[%c0_3, %c0_4] : memref<1x64xf32, #tpu.memory_space<vmem>>, vector<1x64xf32>
    %cst = arith.constant dense<0.000000e+00> : vector<16xf32>
    %3 = vector.multi_reduction <add>, %0, %cst [1] : vector<16x64xf32> to vector<16xf32>
    %4 = vector.shape_cast %3 : vector<16xf32> to vector<16x1xf32>
    %cst_5 = arith.constant 6.400000e+01 : f32
    %5 = vector.broadcast %cst_5 : f32 to vector<16x1xf32>
    %6 = arith.divf %4, %5 : vector<16x1xf32>
    %7 = vector.broadcast %6 : vector<16x1xf32> to vector<16x64xf32>
    %8 = arith.subf %0, %7 : vector<16x64xf32>
    %9 = arith.mulf %8, %8 : vector<16x64xf32>
    %cst_6 = arith.constant dense<0.000000e+00> : vector<16xf32>
    %10 = vector.multi_reduction <add>, %9, %cst_6 [1] : vector<16x64xf32> to vector<16xf32>
    %11 = vector.shape_cast %10 : vector<16xf32> to vector<16x1xf32>
    %cst_7 = arith.constant 6.400000e+01 : f32
    %12 = vector.broadcast %cst_7 : f32 to vector<16x1xf32>
    %13 = arith.divf %11, %12 : vector<16x1xf32>
    %14 = vector.broadcast %6 : vector<16x1xf32> to vector<16x64xf32>
    %15 = arith.subf %0, %14 : vector<16x64xf32>
    %cst_8 = arith.constant 9.99999974E-6 : f32
    %16 = vector.broadcast %cst_8 : f32 to vector<16x1xf32>
    %17 = arith.addf %13, %16 : vector<16x1xf32>
    %18 = math.rsqrt %17 : vector<16x1xf32>
    %19 = vector.broadcast %18 : vector<16x1xf32> to vector<16x64xf32>
    %20 = arith.mulf %15, %19 : vector<16x64xf32>
    %21 = vector.broadcast %1 : vector<1x64xf32> to vector<16x64xf32>
    %22 = arith.mulf %20, %21 : vector<16x64xf32>
    %23 = vector.broadcast %2 : vector<1x64xf32> to vector<16x64xf32>
    %24 = arith.addf %22, %23 : vector<16x64xf32>
    %c0_9 = arith.constant 0 : index
    %c0_10 = arith.constant 0 : index
    %25 = vector.load %arg4[%c0_9, %c0_10] : memref<64x128xf32, #tpu.memory_space<vmem>>, vector<64x128xf32>
    %cst_11 = arith.constant dense<0.000000e+00> : vector<16x128xf32>
    %26 = tpu.matmul %24, %25, %cst_11 {dimension_numbers = #tpu.dot_dimension_numbers<[1], [0], [0], [1], [0, 0, 1, 1], [], []>} : vector<16x64xf32>, vector<64x128xf32>, vector<16x128xf32> -> vector<16x128xf32>
    %c0_12 = arith.constant 0 : index
    %c0_13 = arith.constant 0 : index
    %27 = vector.load %arg5[%c0_12, %c0_13] : memref<16x128xf32, #tpu.memory_space<vmem>>, vector<16x128xf32>
    tpu.vector_store %arg5[%c0_12, %c0_13], %26 {strides = array<i32>} : memref<16x128xf32, #tpu.memory_space<vmem>>, vector<16x128xf32>,
    return
  }
  func.func @transform_0(%arg0: i32) -> (i32, i32) {
    %c0_i32 = arith.constant 0 : i32
    %c0_i32_0 = arith.constant 0 : i32
    %c0_i32_1 = arith.constant 0 : i32
    return %c0_i32, %c0_i32_0 : i32, i32
  }
  func.func @transform_1(%arg0: i32) -> (i32, i32) {
    %c0_i32 = arith.constant 0 : i32
    %c0_i32_0 = arith.constant 0 : i32
    %c0_i32_1 = arith.constant 0 : i32
    return %c0_i32, %c0_i32_0 : i32, i32
  }
  func.func @transform_2(%arg0: i32) -> (i32, i32) {
    %c0_i32 = arith.constant 0 : i32
    %c0_i32_0 = arith.constant 0 : i32
    %c0_i32_1 = arith.constant 0 : i32
    return %c0_i32, %c0_i32_0 : i32, i32
  }
  func.func @transform_3(%arg0: i32) -> (i32, i32) {
    %c0_i32 = arith.constant 0 : i32
    %c0_i32_0 = arith.constant 0 : i32
    return %c0_i32, %arg0 : i32, i32
  }
  func.func @transform_4(%arg0: i32) -> (i32, i32) {
    %c0_i32 = arith.constant 0 : i32
    %c0_i32_0 = arith.constant 0 : i32
    return %c0_i32, %arg0 : i32, i32
  }
}

module attributes {stable_mosaic.version = 11 : i64} {
  func.func @_block_kernel(%arg0: i32, %arg1: memref<1x8x64xf32, #tpu.memory_space<vmem>>, %arg2: memref<1x64xf32, #tpu.memory_space<vmem>>, %arg3: memref<1x64xf32, #tpu.memory_space<vmem>>, %arg4: memref<64x192xf32, #tpu.memory_space<vmem>>, %arg5: memref<1x192xf32, #tpu.memory_space<vmem>>, %arg6: memref<64x64xf32, #tpu.memory_space<vmem>>, %arg7: memref<1x64xf32, #tpu.memory_space<vmem>>, %arg8: memref<1x64xf32, #tpu.memory_space<vmem>>, %arg9: memref<1x64xf32, #tpu.memory_space<vmem>>, %arg10: memref<64x256xf32, #tpu.memory_space<vmem>>, %arg11: memref<1x256xf32, #tpu.memory_space<vmem>>, %arg12: memref<256x64xf32, #tpu.memory_space<vmem>>, %arg13: memref<1x64xf32, #tpu.memory_space<vmem>>, %arg14: memref<1x8x64xf32, #tpu.memory_space<vmem>>) attributes {dimension_semantics = [#tpu.dimension_semantics<parallel>], iteration_bounds = array<i64: 2>, scalar_prefetch = 0 : i64, scratch_operands = 0 : i64, tpu.core_type = #tpu.core_type<tc>, window_params = [{transform_indices = @transform_0, window_bounds = array<i64: 1, 8, 64>}, {pipeline_mode = #tpu.pipeline_mode<synchronous>, transform_indices = @transform_1, window_bounds = array<i64: 1, 64>}, {pipeline_mode = #tpu.pipeline_mode<synchronous>, transform_indices = @transform_2, window_bounds = array<i64: 1, 64>}, {pipeline_mode = #tpu.pipeline_mode<synchronous>, transform_indices = @transform_3, window_bounds = array<i64: 64, 192>}, {pipeline_mode = #tpu.pipeline_mode<synchronous>, transform_indices = @transform_4, window_bounds = array<i64: 1, 192>}, {pipeline_mode = #tpu.pipeline_mode<synchronous>, transform_indices = @transform_5, window_bounds = array<i64: 64, 64>}, {pipeline_mode = #tpu.pipeline_mode<synchronous>, transform_indices = @transform_6, window_bounds = array<i64: 1, 64>}, {pipeline_mode = #tpu.pipeline_mode<synchronous>, transform_indices = @transform_7, window_bounds = array<i64: 1, 64>}, {pipeline_mode = #tpu.pipeline_mode<synchronous>, transform_indices = @transform_8, window_bounds = array<i64: 1, 64>}, {pipeline_mode = #tpu.pipeline_mode<synchronous>, transform_indices = @transform_9, window_bounds = array<i64: 64, 256>}, {pipeline_mode = #tpu.pipeline_mode<synchronous>, transform_indices = @transform_10, window_bounds = array<i64: 1, 256>}, {pipeline_mode = #tpu.pipeline_mode<synchronous>, transform_indices = @transform_11, window_bounds = array<i64: 256, 64>}, {pipeline_mode = #tpu.pipeline_mode<synchronous>, transform_indices = @transform_12, window_bounds = array<i64: 1, 64>}, {transform_indices = @transform_13, window_bounds = array<i64: 1, 8, 64>}]} {
    %c0 = arith.constant 0 : index
    %c0_0 = arith.constant 0 : index
    %c0_1 = arith.constant 0 : index
    %0 = vector.load %arg1[%c0, %c0_0, %c0_1] : memref<1x8x64xf32, #tpu.memory_space<vmem>>, vector<1x8x64xf32>
    %1 = vector.shape_cast %0 : vector<1x8x64xf32> to vector<8x64xf32>
    %c0_2 = arith.constant 0 : index
    %c0_3 = arith.constant 0 : index
    %2 = vector.load %arg2[%c0_2, %c0_3] : memref<1x64xf32, #tpu.memory_space<vmem>>, vector<1x64xf32>
    %c0_4 = arith.constant 0 : index
    %c0_5 = arith.constant 0 : index
    %3 = vector.load %arg3[%c0_4, %c0_5] : memref<1x64xf32, #tpu.memory_space<vmem>>, vector<1x64xf32>
    %cst = arith.constant dense<0.000000e+00> : vector<8xf32>
    %4 = vector.multi_reduction <add>, %1, %cst [1] : vector<8x64xf32> to vector<8xf32>
    %5 = vector.shape_cast %4 : vector<8xf32> to vector<8x1xf32>
    %cst_6 = arith.constant 6.400000e+01 : f32
    %6 = vector.broadcast %cst_6 : f32 to vector<8x1xf32>
    %7 = arith.divf %5, %6 : vector<8x1xf32>
    %8 = vector.broadcast %7 : vector<8x1xf32> to vector<8x64xf32>
    %9 = arith.subf %1, %8 : vector<8x64xf32>
    %10 = arith.mulf %9, %9 : vector<8x64xf32>
    %cst_7 = arith.constant dense<0.000000e+00> : vector<8xf32>
    %11 = vector.multi_reduction <add>, %10, %cst_7 [1] : vector<8x64xf32> to vector<8xf32>
    %12 = vector.shape_cast %11 : vector<8xf32> to vector<8x1xf32>
    %cst_8 = arith.constant 6.400000e+01 : f32
    %13 = vector.broadcast %cst_8 : f32 to vector<8x1xf32>
    %14 = arith.divf %12, %13 : vector<8x1xf32>
    %15 = vector.broadcast %7 : vector<8x1xf32> to vector<8x64xf32>
    %16 = arith.subf %1, %15 : vector<8x64xf32>
    %cst_9 = arith.constant 9.99999974E-6 : f32
    %17 = vector.broadcast %cst_9 : f32 to vector<8x1xf32>
    %18 = arith.addf %14, %17 : vector<8x1xf32>
    %19 = math.rsqrt %18 : vector<8x1xf32>
    %20 = vector.broadcast %19 : vector<8x1xf32> to vector<8x64xf32>
    %21 = arith.mulf %16, %20 : vector<8x64xf32>
    %22 = vector.broadcast %2 : vector<1x64xf32> to vector<8x64xf32>
    %23 = arith.mulf %21, %22 : vector<8x64xf32>
    %24 = vector.broadcast %3 : vector<1x64xf32> to vector<8x64xf32>
    %25 = arith.addf %23, %24 : vector<8x64xf32>
    %c0_10 = arith.constant 0 : index
    %c0_11 = arith.constant 0 : index
    %26 = vector.load %arg4[%c0_10, %c0_11] : memref<64x192xf32, #tpu.memory_space<vmem>>, vector<64x192xf32>
    %cst_12 = arith.constant dense<0.000000e+00> : vector<8x192xf32>
    %27 = tpu.matmul %25, %26, %cst_12 {dimension_numbers = #tpu.dot_dimension_numbers<[1], [0], [0], [1], [0, 0, 1, 1], [], []>} : vector<8x64xf32>, vector<64x192xf32>, vector<8x192xf32> -> vector<8x192xf32>
    %c0_13 = arith.constant 0 : index
    %c0_14 = arith.constant 0 : index
    %28 = vector.load %arg5[%c0_13, %c0_14] : memref<1x192xf32, #tpu.memory_space<vmem>>, vector<1x192xf32>
    %29 = vector.broadcast %28 : vector<1x192xf32> to vector<8x192xf32>
    %30 = arith.addf %27, %29 : vector<8x192xf32>
    %31 = tpu.iota {dimensions = array<i32: 0>} : vector<8x8xi32>
    %32 = tpu.iota {dimensions = array<i32: 1>} : vector<8x8xi32>
    %33 = arith.cmpi sle, %32, %31 : vector<8x8xi32>
    %34 = vector.extract_strided_slice %30 {offsets = [0, 0], sizes = [8, 16], strides = [1, 1]} : vector<8x192xf32> to vector<8x16xf32>
    %35 = vector.extract_strided_slice %30 {offsets = [0, 64], sizes = [8, 16], strides = [1, 1]} : vector<8x192xf32> to vector<8x16xf32>
    %36 = vector.extract_strided_slice %30 {offsets = [0, 128], sizes = [8, 16], strides = [1, 1]} : vector<8x192xf32> to vector<8x16xf32>
    %37 = tpu.transpose %35, [1, 0] : vector<8x16xf32> -> vector<16x8xf32>
    %cst_15 = arith.constant dense<0.000000e+00> : vector<8x8xf32>
    %38 = tpu.matmul %34, %37, %cst_15 {dimension_numbers = #tpu.dot_dimension_numbers<[1], [0], [0], [1], [0, 0, 1, 1], [], []>} : vector<8x16xf32>, vector<16x8xf32>, vector<8x8xf32> -> vector<8x8xf32>
    %cst_16 = arith.constant 2.500000e-01 : f32
    %39 = vector.broadcast %cst_16 : f32 to vector<8x8xf32>
    %40 = arith.mulf %38, %39 : vector<8x8xf32>
    %cst_17 = arith.constant -1.000000e+30 : f32
    %41 = vector.broadcast %cst_17 : f32 to vector<8x8xf32>
    %42 = arith.select %33, %40, %41 : vector<8x8xi1>, vector<8x8xf32>
    %cst_18 = arith.constant dense<0xFF800000> : vector<8xf32>
    %43 = vector.multi_reduction <maximumf>, %42, %cst_18 [1] : vector<8x8xf32> to vector<8xf32>
    %44 = vector.shape_cast %43 : vector<8xf32> to vector<8x1xf32>
    %45 = vector.broadcast %44 : vector<8x1xf32> to vector<8x8xf32>
    %46 = arith.subf %42, %45 : vector<8x8xf32>
    %47 = math.exp %46 : vector<8x8xf32>
    %cst_19 = arith.constant dense<0.000000e+00> : vector<8xf32>
    %48 = vector.multi_reduction <add>, %47, %cst_19 [1] : vector<8x8xf32> to vector<8xf32>
    %49 = vector.shape_cast %48 : vector<8xf32> to vector<8x1xf32>
    %50 = tpu.reciprocal %49 {approx = true} : vector<8x1xf32> -> vector<8x1xf32>
    %51 = vector.broadcast %50 : vector<8x1xf32> to vector<8x8xf32>
    %52 = arith.mulf %47, %51 : vector<8x8xf32>
    %cst_20 = arith.constant dense<0.000000e+00> : vector<8x16xf32>
    %53 = tpu.matmul %52, %36, %cst_20 {dimension_numbers = #tpu.dot_dimension_numbers<[1], [0], [0], [1], [0, 0, 1, 1], [], []>} : vector<8x8xf32>, vector<8x16xf32>, vector<8x16xf32> -> vector<8x16xf32>
    %54 = vector.extract_strided_slice %30 {offsets = [0, 16], sizes = [8, 16], strides = [1, 1]} : vector<8x192xf32> to vector<8x16xf32>
    %55 = vector.extract_strided_slice %30 {offsets = [0, 80], sizes = [8, 16], strides = [1, 1]} : vector<8x192xf32> to vector<8x16xf32>
    %56 = vector.extract_strided_slice %30 {offsets = [0, 144], sizes = [8, 16], strides = [1, 1]} : vector<8x192xf32> to vector<8x16xf32>
    %57 = tpu.transpose %55, [1, 0] : vector<8x16xf32> -> vector<16x8xf32>
    %cst_21 = arith.constant dense<0.000000e+00> : vector<8x8xf32>
    %58 = tpu.matmul %54, %57, %cst_21 {dimension_numbers = #tpu.dot_dimension_numbers<[1], [0], [0], [1], [0, 0, 1, 1], [], []>} : vector<8x16xf32>, vector<16x8xf32>, vector<8x8xf32> -> vector<8x8xf32>
    %cst_22 = arith.constant 2.500000e-01 : f32
    %59 = vector.broadcast %cst_22 : f32 to vector<8x8xf32>
    %60 = arith.mulf %58, %59 : vector<8x8xf32>
    %cst_23 = arith.constant -1.000000e+30 : f32
    %61 = vector.broadcast %cst_23 : f32 to vector<8x8xf32>
    %62 = arith.select %33, %60, %61 : vector<8x8xi1>, vector<8x8xf32>
    %cst_24 = arith.constant dense<0xFF800000> : vector<8xf32>
    %63 = vector.multi_reduction <maximumf>, %62, %cst_24 [1] : vector<8x8xf32> to vector<8xf32>
    %64 = vector.shape_cast %63 : vector<8xf32> to vector<8x1xf32>
    %65 = vector.broadcast %64 : vector<8x1xf32> to vector<8x8xf32>
    %66 = arith.subf %62, %65 : vector<8x8xf32>
    %67 = math.exp %66 : vector<8x8xf32>
    %cst_25 = arith.constant dense<0.000000e+00> : vector<8xf32>
    %68 = vector.multi_reduction <add>, %67, %cst_25 [1] : vector<8x8xf32> to vector<8xf32>
    %69 = vector.shape_cast %68 : vector<8xf32> to vector<8x1xf32>
    %70 = tpu.reciprocal %69 {approx = true} : vector<8x1xf32> -> vector<8x1xf32>
    %71 = vector.broadcast %70 : vector<8x1xf32> to vector<8x8xf32>
    %72 = arith.mulf %67, %71 : vector<8x8xf32>
    %cst_26 = arith.constant dense<0.000000e+00> : vector<8x16xf32>
    %73 = tpu.matmul %72, %56, %cst_26 {dimension_numbers = #tpu.dot_dimension_numbers<[1], [0], [0], [1], [0, 0, 1, 1], [], []>} : vector<8x8xf32>, vector<8x16xf32>, vector<8x16xf32> -> vector<8x16xf32>
    %74 = vector.extract_strided_slice %30 {offsets = [0, 32], sizes = [8, 16], strides = [1, 1]} : vector<8x192xf32> to vector<8x16xf32>
    %75 = vector.extract_strided_slice %30 {offsets = [0, 96], sizes = [8, 16], strides = [1, 1]} : vector<8x192xf32> to vector<8x16xf32>
    %76 = vector.extract_strided_slice %30 {offsets = [0, 160], sizes = [8, 16], strides = [1, 1]} : vector<8x192xf32> to vector<8x16xf32>
    %77 = tpu.transpose %75, [1, 0] : vector<8x16xf32> -> vector<16x8xf32>
    %cst_27 = arith.constant dense<0.000000e+00> : vector<8x8xf32>
    %78 = tpu.matmul %74, %77, %cst_27 {dimension_numbers = #tpu.dot_dimension_numbers<[1], [0], [0], [1], [0, 0, 1, 1], [], []>} : vector<8x16xf32>, vector<16x8xf32>, vector<8x8xf32> -> vector<8x8xf32>
    %cst_28 = arith.constant 2.500000e-01 : f32
    %79 = vector.broadcast %cst_28 : f32 to vector<8x8xf32>
    %80 = arith.mulf %78, %79 : vector<8x8xf32>
    %cst_29 = arith.constant -1.000000e+30 : f32
    %81 = vector.broadcast %cst_29 : f32 to vector<8x8xf32>
    %82 = arith.select %33, %80, %81 : vector<8x8xi1>, vector<8x8xf32>
    %cst_30 = arith.constant dense<0xFF800000> : vector<8xf32>
    %83 = vector.multi_reduction <maximumf>, %82, %cst_30 [1] : vector<8x8xf32> to vector<8xf32>
    %84 = vector.shape_cast %83 : vector<8xf32> to vector<8x1xf32>
    %85 = vector.broadcast %84 : vector<8x1xf32> to vector<8x8xf32>
    %86 = arith.subf %82, %85 : vector<8x8xf32>
    %87 = math.exp %86 : vector<8x8xf32>
    %cst_31 = arith.constant dense<0.000000e+00> : vector<8xf32>
    %88 = vector.multi_reduction <add>, %87, %cst_31 [1] : vector<8x8xf32> to vector<8xf32>
    %89 = vector.shape_cast %88 : vector<8xf32> to vector<8x1xf32>
    %90 = tpu.reciprocal %89 {approx = true} : vector<8x1xf32> -> vector<8x1xf32>
    %91 = vector.broadcast %90 : vector<8x1xf32> to vector<8x8xf32>
    %92 = arith.mulf %87, %91 : vector<8x8xf32>
    %cst_32 = arith.constant dense<0.000000e+00> : vector<8x16xf32>
    %93 = tpu.matmul %92, %76, %cst_32 {dimension_numbers = #tpu.dot_dimension_numbers<[1], [0], [0], [1], [0, 0, 1, 1], [], []>} : vector<8x8xf32>, vector<8x16xf32>, vector<8x16xf32> -> vector<8x16xf32>
    %94 = vector.extract_strided_slice %30 {offsets = [0, 48], sizes = [8, 16], strides = [1, 1]} : vector<8x192xf32> to vector<8x16xf32>
    %95 = vector.extract_strided_slice %30 {offsets = [0, 112], sizes = [8, 16], strides = [1, 1]} : vector<8x192xf32> to vector<8x16xf32>
    %96 = vector.extract_strided_slice %30 {offsets = [0, 176], sizes = [8, 16], strides = [1, 1]} : vector<8x192xf32> to vector<8x16xf32>
    %97 = tpu.transpose %95, [1, 0] : vector<8x16xf32> -> vector<16x8xf32>
    %cst_33 = arith.constant dense<0.000000e+00> : vector<8x8xf32>
    %98 = tpu.matmul %94, %97, %cst_33 {dimension_numbers = #tpu.dot_dimension_numbers<[1], [0], [0], [1], [0, 0, 1, 1], [], []>} : vector<8x16xf32>, vector<16x8xf32>, vector<8x8xf32> -> vector<8x8xf32>
    %cst_34 = arith.constant 2.500000e-01 : f32
    %99 = vector.broadcast %cst_34 : f32 to vector<8x8xf32>
    %100 = arith.mulf %98, %99 : vector<8x8xf32>
    %cst_35 = arith.constant -1.000000e+30 : f32
    %101 = vector.broadcast %cst_35 : f32 to vector<8x8xf32>
    %102 = arith.select %33, %100, %101 : vector<8x8xi1>, vector<8x8xf32>
    %cst_36 = arith.constant dense<0xFF800000> : vector<8xf32>
    %103 = vector.multi_reduction <maximumf>, %102, %cst_36 [1] : vector<8x8xf32> to vector<8xf32>
    %104 = vector.shape_cast %103 : vector<8xf32> to vector<8x1xf32>
    %105 = vector.broadcast %104 : vector<8x1xf32> to vector<8x8xf32>
    %106 = arith.subf %102, %105 : vector<8x8xf32>
    %107 = math.exp %106 : vector<8x8xf32>
    %cst_37 = arith.constant dense<0.000000e+00> : vector<8xf32>
    %108 = vector.multi_reduction <add>, %107, %cst_37 [1] : vector<8x8xf32> to vector<8xf32>
    %109 = vector.shape_cast %108 : vector<8xf32> to vector<8x1xf32>
    %110 = tpu.reciprocal %109 {approx = true} : vector<8x1xf32> -> vector<8x1xf32>
    %111 = vector.broadcast %110 : vector<8x1xf32> to vector<8x8xf32>
    %112 = arith.mulf %107, %111 : vector<8x8xf32>
    %cst_38 = arith.constant dense<0.000000e+00> : vector<8x16xf32>
    %113 = tpu.matmul %112, %96, %cst_38 {dimension_numbers = #tpu.dot_dimension_numbers<[1], [0], [0], [1], [0, 0, 1, 1], [], []>} : vector<8x8xf32>, vector<8x16xf32>, vector<8x16xf32> -> vector<8x16xf32>
    %114 = tpu.concatenate %53, %73, %93, %113 in 1 : vector<8x16xf32>, vector<8x16xf32>, vector<8x16xf32>, vector<8x16xf32> -> vector<8x64xf32>
    %c0_39 = arith.constant 0 : index
    %c0_40 = arith.constant 0 : index
    %115 = vector.load %arg6[%c0_39, %c0_40] : memref<64x64xf32, #tpu.memory_space<vmem>>, vector<64x64xf32>
    %cst_41 = arith.constant dense<0.000000e+00> : vector<8x64xf32>
    %116 = tpu.matmul %114, %115, %cst_41 {dimension_numbers = #tpu.dot_dimension_numbers<[1], [0], [0], [1], [0, 0, 1, 1], [], []>} : vector<8x64xf32>, vector<64x64xf32>, vector<8x64xf32> -> vector<8x64xf32>
    %c0_42 = arith.constant 0 : index
    %c0_43 = arith.constant 0 : index
    %117 = vector.load %arg7[%c0_42, %c0_43] : memref<1x64xf32, #tpu.memory_space<vmem>>, vector<1x64xf32>
    %118 = vector.broadcast %117 : vector<1x64xf32> to vector<8x64xf32>
    %119 = arith.addf %116, %118 : vector<8x64xf32>
    %120 = arith.addf %1, %119 : vector<8x64xf32>
    %c0_44 = arith.constant 0 : index
    %c0_45 = arith.constant 0 : index
    %121 = vector.load %arg8[%c0_44, %c0_45] : memref<1x64xf32, #tpu.memory_space<vmem>>, vector<1x64xf32>
    %c0_46 = arith.constant 0 : index
    %c0_47 = arith.constant 0 : index
    %122 = vector.load %arg9[%c0_46, %c0_47] : memref<1x64xf32, #tpu.memory_space<vmem>>, vector<1x64xf32>
    %cst_48 = arith.constant dense<0.000000e+00> : vector<8xf32>
    %123 = vector.multi_reduction <add>, %120, %cst_48 [1] : vector<8x64xf32> to vector<8xf32>
    %124 = vector.shape_cast %123 : vector<8xf32> to vector<8x1xf32>
    %cst_49 = arith.constant 6.400000e+01 : f32
    %125 = vector.broadcast %cst_49 : f32 to vector<8x1xf32>
    %126 = arith.divf %124, %125 : vector<8x1xf32>
    %127 = vector.broadcast %126 : vector<8x1xf32> to vector<8x64xf32>
    %128 = arith.subf %120, %127 : vector<8x64xf32>
    %129 = arith.mulf %128, %128 : vector<8x64xf32>
    %cst_50 = arith.constant dense<0.000000e+00> : vector<8xf32>
    %130 = vector.multi_reduction <add>, %129, %cst_50 [1] : vector<8x64xf32> to vector<8xf32>
    %131 = vector.shape_cast %130 : vector<8xf32> to vector<8x1xf32>
    %cst_51 = arith.constant 6.400000e+01 : f32
    %132 = vector.broadcast %cst_51 : f32 to vector<8x1xf32>
    %133 = arith.divf %131, %132 : vector<8x1xf32>
    %134 = vector.broadcast %126 : vector<8x1xf32> to vector<8x64xf32>
    %135 = arith.subf %120, %134 : vector<8x64xf32>
    %cst_52 = arith.constant 9.99999974E-6 : f32
    %136 = vector.broadcast %cst_52 : f32 to vector<8x1xf32>
    %137 = arith.addf %133, %136 : vector<8x1xf32>
    %138 = math.rsqrt %137 : vector<8x1xf32>
    %139 = vector.broadcast %138 : vector<8x1xf32> to vector<8x64xf32>
    %140 = arith.mulf %135, %139 : vector<8x64xf32>
    %141 = vector.broadcast %121 : vector<1x64xf32> to vector<8x64xf32>
    %142 = arith.mulf %140, %141 : vector<8x64xf32>
    %143 = vector.broadcast %122 : vector<1x64xf32> to vector<8x64xf32>
    %144 = arith.addf %142, %143 : vector<8x64xf32>
    %c0_53 = arith.constant 0 : index
    %c0_54 = arith.constant 0 : index
    %145 = vector.load %arg10[%c0_53, %c0_54] : memref<64x256xf32, #tpu.memory_space<vmem>>, vector<64x256xf32>
    %cst_55 = arith.constant dense<0.000000e+00> : vector<8x256xf32>
    %146 = tpu.matmul %144, %145, %cst_55 {dimension_numbers = #tpu.dot_dimension_numbers<[1], [0], [0], [1], [0, 0, 1, 1], [], []>} : vector<8x64xf32>, vector<64x256xf32>, vector<8x256xf32> -> vector<8x256xf32>
    %c0_56 = arith.constant 0 : index
    %c0_57 = arith.constant 0 : index
    %147 = vector.load %arg11[%c0_56, %c0_57] : memref<1x256xf32, #tpu.memory_space<vmem>>, vector<1x256xf32>
    %148 = vector.broadcast %147 : vector<1x256xf32> to vector<8x256xf32>
    %149 = arith.addf %146, %148 : vector<8x256xf32>
    %cst_58 = arith.constant 0.636619746 : f32
    %150 = math.sqrt %cst_58 : f32
    %cst_59 = arith.constant 5.000000e-01 : f32
    %151 = vector.broadcast %cst_59 : f32 to vector<8x256xf32>
    %152 = arith.mulf %151, %149 : vector<8x256xf32>
    %cst_60 = arith.constant 4.471500e-02 : f32
    %153 = vector.broadcast %cst_60 : f32 to vector<8x256xf32>
    %154 = arith.mulf %153, %149 : vector<8x256xf32>
    %155 = arith.mulf %154, %149 : vector<8x256xf32>
    %156 = arith.mulf %155, %149 : vector<8x256xf32>
    %157 = arith.addf %149, %156 : vector<8x256xf32>
    %158 = vector.broadcast %150 : f32 to vector<8x256xf32>
    %159 = arith.mulf %158, %157 : vector<8x256xf32>
    %160 = math.tanh %159 : vector<8x256xf32>
    %cst_61 = arith.constant 1.000000e+00 : f32
    %161 = vector.broadcast %cst_61 : f32 to vector<8x256xf32>
    %162 = arith.addf %161, %160 : vector<8x256xf32>
    %163 = arith.mulf %152, %162 : vector<8x256xf32>
    %c0_62 = arith.constant 0 : index
    %c0_63 = arith.constant 0 : index
    %164 = vector.load %arg12[%c0_62, %c0_63] : memref<256x64xf32, #tpu.memory_space<vmem>>, vector<256x64xf32>
    %cst_64 = arith.constant dense<0.000000e+00> : vector<8x64xf32>
    %165 = tpu.matmul %163, %164, %cst_64 {dimension_numbers = #tpu.dot_dimension_numbers<[1], [0], [0], [1], [0, 0, 1, 1], [], []>} : vector<8x256xf32>, vector<256x64xf32>, vector<8x64xf32> -> vector<8x64xf32>
    %c0_65 = arith.constant 0 : index
    %c0_66 = arith.constant 0 : index
    %166 = vector.load %arg13[%c0_65, %c0_66] : memref<1x64xf32, #tpu.memory_space<vmem>>, vector<1x64xf32>
    %167 = vector.broadcast %166 : vector<1x64xf32> to vector<8x64xf32>
    %168 = arith.addf %165, %167 : vector<8x64xf32>
    %169 = arith.addf %120, %168 : vector<8x64xf32>
    %c0_67 = arith.constant 0 : index
    %c0_68 = arith.constant 0 : index
    %c0_69 = arith.constant 0 : index
    %170 = vector.load %arg14[%c0_67, %c0_68, %c0_69] : memref<1x8x64xf32, #tpu.memory_space<vmem>>, vector<1x8x64xf32>
    %171 = vector.shape_cast %170 : vector<1x8x64xf32> to vector<8x64xf32>
    %172 = vector.shape_cast %169 : vector<8x64xf32> to vector<1x8x64xf32>
    tpu.vector_store %arg14[%c0_67, %c0_68, %c0_69], %172 {strides = array<i32>} : memref<1x8x64xf32, #tpu.memory_space<vmem>>, vector<1x8x64xf32>,
    return
  }
  func.func @transform_0(%arg0: i32) -> (i32, i32, i32) {
    %c0_i32 = arith.constant 0 : i32
    %c0_i32_0 = arith.constant 0 : i32
    %c0_i32_1 = arith.constant 0 : i32
    return %arg0, %c0_i32, %c0_i32_0 : i32, i32, i32
  }
  func.func @transform_1(%arg0: i32) -> (i32, i32) {
    %c0_i32 = arith.constant 0 : i32
    %c0_i32_0 = arith.constant 0 : i32
    %c0_i32_1 = arith.constant 0 : i32
    return %c0_i32, %c0_i32_0 : i32, i32
  }
  func.func @transform_2(%arg0: i32) -> (i32, i32) {
    %c0_i32 = arith.constant 0 : i32
    %c0_i32_0 = arith.constant 0 : i32
    %c0_i32_1 = arith.constant 0 : i32
    return %c0_i32, %c0_i32_0 : i32, i32
  }
  func.func @transform_3(%arg0: i32) -> (i32, i32) {
    %c0_i32 = arith.constant 0 : i32
    %c0_i32_0 = arith.constant 0 : i32
    %c0_i32_1 = arith.constant 0 : i32
    return %c0_i32, %c0_i32_0 : i32, i32
  }
  func.func @transform_4(%arg0: i32) -> (i32, i32) {
    %c0_i32 = arith.constant 0 : i32
    %c0_i32_0 = arith.constant 0 : i32
    %c0_i32_1 = arith.constant 0 : i32
    return %c0_i32, %c0_i32_0 : i32, i32
  }
  func.func @transform_5(%arg0: i32) -> (i32, i32) {
    %c0_i32 = arith.constant 0 : i32
    %c0_i32_0 = arith.constant 0 : i32
    %c0_i32_1 = arith.constant 0 : i32
    return %c0_i32, %c0_i32_0 : i32, i32
  }
  func.func @transform_6(%arg0: i32) -> (i32, i32) {
    %c0_i32 = arith.constant 0 : i32
    %c0_i32_0 = arith.constant 0 : i32
    %c0_i32_1 = arith.constant 0 : i32
    return %c0_i32, %c0_i32_0 : i32, i32
  }
  func.func @transform_7(%arg0: i32) -> (i32, i32) {
    %c0_i32 = arith.constant 0 : i32
    %c0_i32_0 = arith.constant 0 : i32
    %c0_i32_1 = arith.constant 0 : i32
    return %c0_i32, %c0_i32_0 : i32, i32
  }
  func.func @transform_8(%arg0: i32) -> (i32, i32) {
    %c0_i32 = arith.constant 0 : i32
    %c0_i32_0 = arith.constant 0 : i32
    %c0_i32_1 = arith.constant 0 : i32
    return %c0_i32, %c0_i32_0 : i32, i32
  }
  func.func @transform_9(%arg0: i32) -> (i32, i32) {
    %c0_i32 = arith.constant 0 : i32
    %c0_i32_0 = arith.constant 0 : i32
    %c0_i32_1 = arith.constant 0 : i32
    return %c0_i32, %c0_i32_0 : i32, i32
  }
  func.func @transform_10(%arg0: i32) -> (i32, i32) {
    %c0_i32 = arith.constant 0 : i32
    %c0_i32_0 = arith.constant 0 : i32
    %c0_i32_1 = arith.constant 0 : i32
    return %c0_i32, %c0_i32_0 : i32, i32
  }
  func.func @transform_11(%arg0: i32) -> (i32, i32) {
    %c0_i32 = arith.constant 0 : i32
    %c0_i32_0 = arith.constant 0 : i32
    %c0_i32_1 = arith.constant 0 : i32
    return %c0_i32, %c0_i32_0 : i32, i32
  }
  func.func @transform_12(%arg0: i32) -> (i32, i32) {
    %c0_i32 = arith.constant 0 : i32
    %c0_i32_0 = arith.constant 0 : i32
    %c0_i32_1 = arith.constant 0 : i32
    return %c0_i32, %c0_i32_0 : i32, i32
  }
  func.func @transform_13(%arg0: i32) -> (i32, i32, i32) {
    %c0_i32 = arith.constant 0 : i32
    %c0_i32_0 = arith.constant 0 : i32
    %c0_i32_1 = arith.constant 0 : i32
    return %arg0, %c0_i32, %c0_i32_0 : i32, i32, i32
  }
}

</mosaic_0001>

<bundles_post_ra>
// kernel: gpt2_forward.5
= control target key start
LH: loop header
LB: loop body
LE: loop exit
PB: predicated region body
PF: predicated region fallthrough
CT: control target
= control target key end

     0   :  { %9 = vsyncpa [#allocation4], 0  ;;  %s731_s0 = inlined_call_operand.vmem [shape: f32[16,64], index: 0, kind: input, shape index: {}]   ;;  %s732_s1 = inlined_call_operand.vmem [shape: f32[1,64], index: 1, kind: input, shape index: {}]   ;;  %s733_s2 = inlined_call_operand.vmem [shape: f32[1,64], index: 2, kind: input, shape index: {}]   ;;  %s734_s3 = inlined_call_operand.vmem [shape: f32[64,256], index: 3, kind: input, shape index: {}]   ;;  %s735_s4 = inlined_call_operand.hbm [shape: f32[16,256], index: 4, kind: output, shape index: {}]  }
   0x1   :  { %11 = vsyncpa [#allocation4 + $0x1], 0  ;;  %s613_s15 = smov 0   ;;  %s615_s16 = smov 0  }
   0x2   :  { %s617_s17 = smov 0   ;;  %s619_s18 = smov 0  }
   0x3 LB: > { %s446_s19 = sadd.s32 4294967295, %s582_s18   ;;  %s447_s20 = sadd.s32 4294967294, %s582_s18   ;;  %s582_s18 = sphi %s619_s18, %s741_s18   ;;  %s578_s17 = sphi %s617_s17, %s740_s17   ;;  %s574_s16 = sphi %s615_s16, %s739_s16   ;;  %s570_s15 = sphi %s613_s15, %s738_s15  }
   0x4   : > { %s636_s21 = sadd.s32 1, %s582_s18   ;;  %s87_s22 = sadd.s32 1, %s578_s17 }
   0x5   : > { %s84_s23 = ssub.s32 %s582_s18, %s636_s21  ;;  %p94_p0 = scmp.ne.s32.totalorder %s578_s17, %s574_s16 }
   0x6   : > { %p85_p1 = scmp.eq.s32.totalorder %s84_s23, 0  ;;  %p95_p2 = scmp.eq.s32.totalorder %s582_s18, 0 }
   0x7   : > { %p124_p3 = scmp.eq.s32.totalorder %s446_s19, 1  ;;  %p129_p4 = scmp.ne.s32.totalorder %s574_s16, %s570_s15 }
   0x8   : > { %s649_s24 = scalar_select %p85_p1, %s578_s17, %s87_s22  }
   0x9   : > { %p96_p5 = por %p95_p2, %p94_p0  ;;  %p651_p6 = por %p124_p3, %p94_p0 }
   0xa   : > { %p130_p7 = scmp.eq.s32.totalorder %s447_s20, 1  ;;  %p449_p9 = scmp.ge.s32.totalorder %s582_s18, 2 }
   0xc   : > { %p655_p8 = por %p130_p7, %p129_p4  ;;  %155 = sbr.rel (%p449_p9) target bundleno = 29 (0x1d), region = 28 }
  0x11   : > { %158 = sbr.rel (!%p96_p5) target bundleno = 29 (0x1d), region = 32  ;;  %s160_s27 = sand.u32 (%p96_p5), 1, %s578_s17  }
  0x12   : > { %s451_s28 = sshll.u32 (%p96_p5), %s582_s18, 3  ;;  %s450_s29 = sshll.u32 (%p96_p5), %s160_s27, 6 }
  0x13   : > { %s164_s6 = scalar_lea.vmem (%p96_p5), %s734_s3, %s451_s28  ;;  %s162_s7 = scalar_lea.vmem (%p96_p5), [#allocation2], %s450_s29 }
  0x14   : > { %v207_v0 = vld [vmem:[%s164_s6] sm:$0xff] (%p96_p5)  ;;  %v209_v1 = vld [vmem:[%s164_s6 + $0x10] sm:$0xff] (%p96_p5) }
  0x15   : > { %v211_v2 = vld [vmem:[%s164_s6 + $0x20] sm:$0xff] (%p96_p5)  ;;  %208 = vst [vmem:[%s162_s7] sm:$0xff] (%p96_p5), %v207_v0  ;;  %v213_v3 = vld [vmem:[%s164_s6 + $0x30] sm:$0xff] (%p96_p5) }
  0x16   : > { %210 = vst [vmem:[%s162_s7 + $0x8] sm:$0xff] %v209_v1  ;;  %v215_v4 = vld [vmem:[%s164_s6 + $0x40] sm:$0xff]  ;;  %v217_v5 = vld [vmem:[%s164_s6 + $0x50] sm:$0xff] }
  0x17   : > { %212 = vst [vmem:[%s162_s7 + $0x10] sm:$0xff] %v211_v2  ;;  %v219_v6 = vld [vmem:[%s164_s6 + $0x60] sm:$0xff]  ;;  %v221_v7 = vld [vmem:[%s164_s6 + $0x70] sm:$0xff] }
  0x18   : > { %214 = vst [vmem:[%s162_s7 + $0x18] sm:$0xff] %v213_v3 }
  0x19   : > { %216 = vst [vmem:[%s162_s7 + $0x20] sm:$0xff] %v215_v4 }
  0x1a   : > { %218 = vst [vmem:[%s162_s7 + $0x28] sm:$0xff] %v217_v5 }
  0x1b   : > { %220 = vst [vmem:[%s162_s7 + $0x30] sm:$0xff] %v219_v6 }
  0x1c   : > { %222 = vst [vmem:[%s162_s7 + $0x38] sm:$0xff] %v221_v7 }
  0x1d PF: > { %p452_p10 = scmp.ge.s32.totalorder %s582_s18, 1  ;;  %p227_p11 = scmp.lt.s32.totalorder %s582_s18, 3 }
  0x1f   : > { %p228_p12 = pnand %p452_p10, %p227_p11 }
  0x20   : > { %s684_s12 = sand.u32 (!%p228_p12), 1, %s574_s16   ;;  %s458_s29 = sshll.u32 (!%p228_p12), %s446_s19, 3 }
  0x21   : > { %231 = sbr.rel (%p228_p12) target bundleno = 446 (0x1be), region = 70  ;;  %s453_s13 = sshll.u32 (!%p228_p12), %s684_s12, 6 }
  0x22   : > { %s236_s14 = scalar_lea.vmem (!%p228_p12), [#allocation2], %s453_s13  ;;  %s454_s28 = sshll.u32 (!%p228_p12), %s684_s12, 4 }
  0x23   : > { %s375_s6 = scalar_lea.hbm (!%p228_p12), %s735_s4, %s458_s29  ;;  %s258_s7 = scalar_lea.vmem (!%p228_p12), [#allocation3], %s454_s28 }
  0x24   : > { %s376_s8 = sshll.u32 (!%p228_p12), %s258_s7, 4  ;;  %s378_s9 = sshll.u32 (!%p228_p12), %s375_s6, 4  ;;  %s377_s8 = int_to_ptr.vmem [resolvable:$true] %s376_s8  ;;  %s379_s9 = int_to_ptr.hbm [resolvable:$true] %s378_s9 }
  0x25   : > { %s365_s10 = scalar_lea.sflag (!%p228_p12), [#allocation4], %s684_s12  ;;  %s534_s11 = sshra.s32 (!%p228_p12), %s379_s9, 4  ;;  %s535_s11 = int_to_ptr.hbm [resolvable:$true] %s534_s11 }
  0x26   : > { %v259_v8 = vld [vmem:[%s731_s0] sm:$0xff]  ;;  %vm263_vm0 = vcmask 523264   ;;  %v260_v10 = vld [vmem:[%s731_s0 + $0x8] sm:$0xff]  ;;  %v584_v12 = vmov 64.0   ;;  %v332_v29 = vld [vmem:[%s236_s14 + $0x38] sm:$0xff]  ;;  %s536_s13 = scalar_lea.hbm %s535_s11, 16  ;;  %p541_p2 = scmp.lt.s32.totalorder %s535_s11, %s735_s4 }
  0x27   : > { %v264_v9 = vsel %vm263_vm0, %v259_v8, 0.0  ;;  %v267_v11 = vsel %vm263_vm0, %v260_v10, 0.0  ;;  %514 = vrcp.f32 %v584_v12  ;;  %347 = vmatpush.msra.mxu0 %v332_v29  ;;  %461 = vmatpush.msra.mxu1 %v332_v29  ;;  %v331_v30 = vld [vmem:[%s236_s14 + $0x30] sm:$0xff]  ;;  %v330_v31 = vld [vmem:[%s236_s14 + $0x28] sm:$0xff]  ;;  %v329_v32 = vld [vmem:[%s236_s14 + $0x20] sm:$0xff]  ;;  %p537_p13 = scmp.ne.s32.totalorder %s535_s11, %s536_s13  ;;  %s540_s20 = scalar_lea.hbm %s735_s4, 32 }
  0x28   : > { %265 = vadd.xlane.f32.xlu0 %v264_v9  ;;  %v328_v33 = vld [vmem:[%s236_s14 + $0x18] sm:$0xff]  ;;  %v327_v34 = vld [vmem:[%s236_s14 + $0x10] sm:$0xff]  ;;  %v326_v35 = vld [vmem:[%s236_s14 + $0x8] sm:$0xff]  ;;  %p542_p3 = scmp.lt.s32.totalorder %s540_s20, %s536_s13 }
  0x29   : > { %348 = vmatpush.msra.mxu0 %v331_v30  ;;  %462 = vmatpush.msra.mxu1 %v331_v30  ;;  %v325_v36 = vld [vmem:[%s236_s14] sm:$0xff]  ;;  %p538_p0 = pnand %p537_p13, %p651_p6 }
  0x2a   : > { %v512_v51 = vld [vmem:[%s732_s1] ss:$0 sm:$0xff]  ;;  %p543_p4 = por %p542_p3, %p541_p2 }
  0x2b   : > { %349 = vmatpush.msra.mxu0 %v330_v31  ;;  %463 = vmatpush.msra.mxu1 %v330_v31  ;;  %v513_v55 = vld [vmem:[%s733_s2] ss:$0 sm:$0xff]  ;;  %p539_p1 = pneg %p538_p0 }
  0x2d   : > { %v515_v13 = vpop.eup %514  ;;  %350 = vmatpush.msra.mxu0 %v329_v32  ;;  %464 = vmatpush.msra.mxu1 %v329_v32  ;;  %p544_p5 = pnand %p543_p4, %p539_p1 }
  0x2e   : > { %v271_v14 = vmul.f32 64.0, %v515_v13  ;;  %vm275_vm1 = vweird.f32 %v515_v13 }
  0x2f   : > { %351 = vmatpush.msra.mxu0 %v328_v33  ;;  %465 = vmatpush.msra.mxu1 %v328_v33 }
  0x30   : > { %268 = vadd.xlane.f32.xlu0 %v267_v11  ;;  %v272_v15 = vsub.f32 1.0, %v271_v14 }
  0x31   : > { %352 = vmatpush.msra.mxu0 %v327_v34  ;;  %466 = vmatpush.msra.mxu1 %v327_v34 }
  0x32   : > { %v273_v16 = vmul.f32 %v515_v13, %v272_v15 }
  0x33   : > { %353 = vmatpush.msra.mxu0 %v326_v35  ;;  %467 = vmatpush.msra.mxu1 %v326_v35 }
  0x34   : > { %v274_v17 = vadd.f32 %v515_v13, %v273_v16 }
  0x35   : > { %354 = vmatpush.msra.mxu0 %v325_v36  ;;  %468 = vmatpush.msra.mxu1 %v325_v36 }
  0x36   : > { %v276_v18 = vsel %vm275_vm1, %v515_v13, %v274_v17 }
  0x9b   : > { %v266_v19 = vpop.xlane.xlu0 %265 }
  0x9c   : > { %v277_v20 = vmul.f32 %v276_v18, %v266_v19 }
  0x9e   : > { %v279_v21 = vsub.f32 %v259_v8, %v277_v20 }
  0xa0   : > { %v281_v22 = vmul.f32 %v279_v21, %v279_v21 }
  0xa2   : > { %v283_v23 = vsel %vm263_vm0, %v281_v22, 0.0 }
  0xa3   : > { %284 = vadd.xlane.f32.xlu1 %v283_v23  ;;  %v269_v24 = vpop.xlane.xlu0 %268 }
  0xa4   : > { %v278_v25 = vmul.f32 %v276_v18, %v269_v24 }
  0xa6   : > { %v678_v26 = vsub.f32 %v260_v10, %v278_v25 }
  0xa8   : > { %v282_v27 = vmul.f32 %v678_v26, %v678_v26 }
  0xaa   : > { %v286_v28 = vsel %vm263_vm0, %v282_v27, 0.0 }
  0xab   : > { %287 = vadd.xlane.f32.xlu1 %v286_v28 }
 0x116   : > { %v285_v37 = vpop.xlane.xlu1 %284 }
 0x117   : > { %v289_v38 = vmul.f32 %v285_v37, %v276_v18 }
 0x119   : > { %v291_v39 = vadd.f32 1e-05, %v289_v38 }
 0x11b   : > { %516 = vrsqrt.f32 %v291_v39  ;;  %vm299_vm3 = vweird.f32 %v291_v39 }
 0x11e   : > { %v288_v40 = vpop.xlane.xlu1 %287 }
 0x11f   : > { %v290_v41 = vmul.f32 %v288_v40, %v276_v18 }
 0x121   : > { %v517_v42 = vpop.eup %516  ;;  %v292_v43 = vadd.f32 1e-05, %v290_v41 }
 0x122   : > { %v294_v44 = vmul.f32 %v517_v42, %v291_v39  ;;  %vm300_vm2 = vweird.f32 %v517_v42 }
 0x123   : > { %518 = vrsqrt.f32 %v292_v43  ;;  %vm301_vm4 = vmor %vm299_vm3, %vm300_vm2  ;;  %vm309_vm6 = vweird.f32 %v292_v43 }
 0x124   : > { %v295_v45 = vmul.f32 %v517_v42, %v294_v44 }
 0x126   : > { %v296_v46 = vmul.f32 0.5, %v295_v45 }
 0x128   : > { %v297_v47 = vsub.f32 1.5, %v296_v46 }
 0x129   : > { %v519_v48 = vpop.eup %518 }
 0x12a   : > { %v298_v49 = vmul.f32 %v517_v42, %v297_v47  ;;  %v304_v50 = vmul.f32 %v519_v48, %v292_v43  ;;  %vm310_vm5 = vweird.f32 %v519_v48 }
 0x12b   : > { %vm311_vm7 = vmor %vm309_vm6, %vm310_vm5 }
 0x12c   : > { %v302_v52 = vsel %vm301_vm4, %v517_v42, %v298_v49  ;;  %v305_v53 = vmul.f32 %v519_v48, %v304_v50 }
 0x12d   : > { %v313_v54 = vmul.f32 %v302_v52, %v279_v21 }
 0x12e   : > { %v306_v56 = vmul.f32 0.5, %v305_v53 }
 0x12f   : > { %v318_v57 = vmul.f32 %v512_v51, %v313_v54 }
 0x130   : > { %v307_v58 = vsub.f32 1.5, %v306_v56 }
 0x131   : > { %v323_v59 = vadd.f32 %v513_v55, %v318_v57 }
 0x132   : > { %v308_v60 = vmul.f32 %v519_v48, %v307_v58 }
 0x133   : > { %455 = vmatmul.msk.f32.vlgmr.msra.gmra.mxu0 %vm263_vm0, %v323_v59 }
 0x134   : > { %v312_v61 = vsel %vm311_vm7, %v519_v48, %v308_v60 }
 0x135   : > { %v314_v62 = vmul.f32 %v312_v61, %v678_v26 }
 0x137   : > { %v319_v63 = vmul.f32 %v512_v51, %v314_v62 }
 0x139   : > { %v324_v0 = vadd.f32 %v513_v55, %v319_v63 }
 0x13b   : > { %456 = vmatmul.msk.f32.vlgmr.msra.gmra.mxu1 %vm263_vm0, %v324_v0 }
 0x1b0   : > { %v356_v1 = vpop.f32.mrf.mxu0 }
 0x1b1   : > { %362 = vst [vmem:[%s258_s7] sm:$0xff] %v356_v1 }
 0x1b8   : > { %v359_v2 = vpop.f32.mrf.mxu1 }
 0x1b9   : > { %363 = vst [vmem:[%s258_s7 + $0x8] sm:$0xff] %v359_v2 }
 0x1ba   : > { %547 = shalt.err (!%p544_p5)
}
 0x1bb   : > { %s585_s12 = smov 128   ;;  %s586_s27 = smov 256  }
 0x1bc   : > { %s587_s28 = smov 8  }
 0x1bd   : > { %469 = dma.vmem_to_hbm [thread:$0]  (%p651_p6), %s377_s8, 256, %s379_s9, %s365_s10, %s585_s12, %s586_s27, %s587_s28  }
 0x1be PF: > { %s393_s29 = sand.u32 1, %s570_s15   ;;  %p472_p7 = pnand %p449_p9, %p655_p8 }
 0x1bf   : > { %s394_s30 = scalar_lea.sflag [#allocation4], %s393_s29 }
 0x1c0   : > { %p473_p10 = pneg %p472_p7 }
 0x1c2   : > { %565 = dma.done.wait (%p473_p10), %s394_s30, 256  }
 0x1c3   : > { %567 = vsyncadd (%p473_p10), %s394_s30, 4294967040  ;;  %p14_p11 = scmp.ge.s32.totalorder %s636_s21, 4   ;;  %s738_s15 = smov %s574_s16 }
 0x1c4   : > { %s739_s16 = smov %s578_s17  ;;  %s740_s17 = smov %s649_s24 }
 0x1c5   : > { %s741_s18 = smov %s636_s21  ;;  %16 = sbr.rel (!%p14_p11) target bundleno = 3 (0x3), region = 114 }
 0x1ca   :  { %400 = vsyncpa [#allocation4], 1 }
 0x1cb   :  { %402 = vsyncpa [#allocation4 + $0x1], 1 }

// kernel: gpt2_forward.3
= control target key start
LH: loop header
LB: loop body
LE: loop exit
PB: predicated region body
PF: predicated region fallthrough
CT: control target
= control target key end

     0   :  { %s1273_s25 = smov 0   ;;  %s1609_s0 = inlined_call_operand.vmem [shape: f32[2,8,64], index: 0, kind: input, shape index: {}]   ;;  %s1610_s1 = inlined_call_operand.vmem [shape: f32[1,64], index: 1, kind: input, shape index: {}]   ;;  %s1611_s2 = inlined_call_operand.vmem [shape: f32[1,64], index: 2, kind: input, shape index: {}]   ;;  %s1612_s3 = inlined_call_operand.vmem [shape: f32[64,192], index: 3, kind: input, shape index: {}]   ;;  %s1613_s4 = inlined_call_operand.vmem [shape: f32[1,192], index: 4, kind: input, shape index: {}]   ;;  %s1614_s5 = inlined_call_operand.vmem [shape: f32[64,64], index: 5, kind: input, shape index: {}]   ;;  %s1615_s6 = inlined_call_operand.vmem [shape: f32[1,64], index: 6, kind: input, shape index: {}]   ;;  %s1616_s7 = inlined_call_operand.vmem [shape: f32[1,64], index: 7, kind: input, shape index: {}]   ;;  %s1617_s8 = inlined_call_operand.vmem [shape: f32[1,64], index: 8, kind: input, shape index: {}]   ;;  %s1618_s9 = inlined_call_operand.vmem [shape: f32[64,256], index: 9, kind: input, shape index: {}]   ;;  %s1619_s10 = inlined_call_operand.vmem [shape: f32[1,256], index: 10, kind: input, shape index: {}]   ;;  %s1620_s11 = inlined_call_operand.vmem [shape: f32[256,64], index: 11, kind: input, shape index: {}]   ;;  %s1621_s12 = inlined_call_operand.vmem [shape: f32[1,64], index: 12, kind: input, shape index: {}]   ;;  %s1622_s13 = inlined_call_operand.vmem [shape: f32[2,8,64], index: 13, kind: output, shape index: {}]  }
   0x1 LB: > { %s1113_s26 = sadd.s32 4294967295, %s1193_s25   ;;  %p1117_p0 = scmp.ge.s32.totalorder %s1193_s25, 1  ;;  %s1193_s25 = sphi %s1273_s25, %s23_s25  }
   0x2   : > { %p386_p1 = scmp.lt.s32.totalorder %s1193_s25, 3 }
   0x4   : > { %p387_p2 = pnand %p1117_p0, %p386_p1 }
   0x5   : > { %p428_p3 = scmp.lt.s32.totalorder (!%p387_p2), %s1113_s26, 1  ;;  %s1196_s24 = smov (!%p387_p2), 112  }
   0x6   : > { %390 = sbr.rel (%p387_p2) target bundleno = 2289 (0x8f1), region = 72  ;;  %s1197_s28 = smov (!%p387_p2), 48  }
   0x7   : > { %s1198_s29 = smov (!%p387_p2), 64   ;;  %s1200_s14 = smov (!%p387_p2), 32  }
   0x8   : > { %s1201_s15 = smov (!%p387_p2), 80   ;;  %s1202_s16 = smov (!%p387_p2), 16  }
   0xb   : > { %s1624_s26 = smov (!%p428_p3, %s1113_s26), 1  ;;  %vm439_vm0 = vcmask 523264   ;;  %v1195_v2 = vmov 64.0   ;;  %v491_v14 = vld [vmem:[%s1612_s3 + $0x70] sm:$0xff]  ;;  %v492_v15 = vld [vmem:[%s1612_s3 + $0x78] sm:$0xff]  ;;  %v489_v16 = vld [vmem:[%s1612_s3 + $0x60] sm:$0xff]  ;;  %v542_v54 = vlaneseq }
   0xc   : > { %s1118_s27 = sshll.u32 %s1624_s26, 3  ;;  %1161 = vrcp.f32 %v1195_v2  ;;  %510 = vmatpush.msra.mxu0 %v491_v14  ;;  %530 = vmatpush.msra.mxu1 %v492_v15  ;;  %v490_v17 = vld [vmem:[%s1612_s3 + $0x68] sm:$0xff]  ;;  %v487_v18 = vld [vmem:[%s1612_s3 + $0x50] sm:$0xff]  ;;  %v488_v19 = vld [vmem:[%s1612_s3 + $0x58] sm:$0xff]  ;;  %vm550_vm5 = vcmask 130048   ;;  %vm577_vm7 = vcmask 64512  }
   0xd   : > { %s431_s30 = scalar_lea.vmem %s1609_s0, %s1118_s27  ;;  %v485_v20 = vld [vmem:[%s1612_s3 + $0x40] sm:$0xff]  ;;  %v486_v21 = vld [vmem:[%s1612_s3 + $0x48] sm:$0xff]  ;;  %v483_v22 = vld [vmem:[%s1612_s3 + $0x30] sm:$0xff]  ;;  %v543_v55 = vshrl.u32 %v542_v54, 7  ;;  %v545_v56 = vand.u32 127, %v542_v54  ;;  %vm827_vm8 = vcmask 261120  }
   0xe   : > { %v1289_v0 = vld [vmem:[%s431_s30] sm:$0xff]  ;;  %511 = vmatpush.msra.mxu0 %v489_v16  ;;  %531 = vmatpush.msra.mxu1 %v490_v17  ;;  %v484_v23 = vld [vmem:[%s1612_s3 + $0x38] sm:$0xff]  ;;  %v482_v25 = vld [vmem:[%s1612_s3 + $0x28] sm:$0xff]  ;;  %s1199_s30 = smov 96   ;;  %vm829_vm9 = vcmask 392192  }
   0xf   : > { %v440_v1 = vsel %vm439_vm0, %v1289_v0, 0.0  ;;  %v481_v24 = vld [vmem:[%s1612_s3 + $0x20] sm:$0xff]  ;;  %v479_v26 = vld [vmem:[%s1612_s3 + $0x10] sm:$0xff]  ;;  %v480_v27 = vld [vmem:[%s1612_s3 + $0x18] sm:$0xff]  ;;  %vm546_vm6 = vcmp.le.s32.totalorder %v545_v56, %v543_v55 }
  0x10   : > { %441 = vadd.xlane.f32.xlu0 %v440_v1  ;;  %512 = vmatpush.msra.mxu0 %v487_v18  ;;  %v477_v28 = vld [vmem:[%s1612_s3] sm:$0xff]  ;;  %v478_v29 = vld [vmem:[%s1612_s3 + $0x8] sm:$0xff]  ;;  %v838_v55 = vld [vmem:[%s1614_s5 + $0x38] sm:$0xff] }
  0x11   : > { %532 = vmatpush.msra.mxu1 %v488_v19  ;;  %v1155_v39 = vld [vmem:[%s1610_s1] ss:$0 sm:$0xff]  ;;  %v837_v56 = vld [vmem:[%s1614_s5 + $0x30] sm:$0xff] }
  0x12   : > { %v1162_v3 = vpop.eup %1161  ;;  %513 = vmatpush.msra.mxu0 %v485_v20  ;;  %v1156_v42 = vld [vmem:[%s1611_s2] ss:$0 sm:$0xff] }
  0x13   : > { %v444_v4 = vmul.f32 64.0, %v1162_v3  ;;  %vm448_vm1 = vweird.f32 %v1162_v3  ;;  %533 = vmatpush.msra.mxu1 %v486_v21  ;;  %v493_v45 = vld [vmem:[%s1613_s4] sm:$0x3] }
  0x14   : > { %514 = vmatpush.msra.mxu0 %v483_v22  ;;  %v495_v46 = vperm.slane %v493_v45, 0  ;;  %v496_v47 = vperm.slane %v493_v45, 1 }
  0x15   : > { %v445_v5 = vsub.f32 1.0, %v444_v4  ;;  %534 = vmatpush.msra.mxu1 %v484_v23 }
  0x16   : > { %515 = vmatpush.msra.mxu0 %v481_v24 }
  0x17   : > { %v446_v6 = vmul.f32 %v1162_v3, %v445_v5  ;;  %535 = vmatpush.msra.mxu1 %v482_v25 }
  0x18   : > { %516 = vmatpush.msra.mxu0 %v479_v26 }
  0x19   : > { %v447_v7 = vadd.f32 %v1162_v3, %v446_v6  ;;  %536 = vmatpush.msra.mxu1 %v480_v27 }
  0x1a   : > { %517 = vmatpush.msra.mxu0 %v477_v28 }
  0x1b   : > { %v1293_v8 = vsel %vm448_vm1, %v1162_v3, %v447_v7  ;;  %537 = vmatpush.msra.mxu1 %v478_v29 }
  0x83   : > { %v442_v9 = vpop.xlane.xlu0 %441 }
  0x84   : > { %v450_v10 = vmul.f32 %v1293_v8, %v442_v9 }
  0x86   : > { %v451_v11 = vsub.f32 %v1289_v0, %v450_v10 }
  0x88   : > { %v452_v12 = vmul.f32 %v451_v11, %v451_v11 }
  0x8a   : > { %v453_v13 = vsel %vm439_vm0, %v452_v12, 0.0 }
  0x8b   : > { %454 = vadd.xlane.f32.xlu0 %v453_v13 }
  0xfe   : > { %v455_v30 = vpop.xlane.xlu0 %454 }
  0xff   : > { %v456_v31 = vmul.f32 %v455_v30, %v1293_v8 }
 0x101   : > { %v457_v32 = vadd.f32 1e-05, %v456_v31 }
 0x103   : > { %1163 = vrsqrt.f32 %v457_v32  ;;  %vm464_vm3 = vweird.f32 %v457_v32 }
 0x109   : > { %v1164_v33 = vpop.eup %1163 }
 0x10a   : > { %v459_v34 = vmul.f32 %v1164_v33, %v457_v32  ;;  %vm465_vm2 = vweird.f32 %v1164_v33 }
 0x10b   : > { %vm466_vm4 = vmor %vm464_vm3, %vm465_vm2 }
 0x10c   : > { %v460_v35 = vmul.f32 %v1164_v33, %v459_v34 }
 0x10e   : > { %v461_v36 = vmul.f32 0.5, %v460_v35 }
 0x110   : > { %v462_v37 = vsub.f32 1.5, %v461_v36 }
 0x112   : > { %v463_v38 = vmul.f32 %v1164_v33, %v462_v37 }
 0x114   : > { %v467_v40 = vsel %vm466_vm4, %v1164_v33, %v463_v38 }
 0x115   : > { %v468_v41 = vmul.f32 %v467_v40, %v451_v11 }
 0x117   : > { %v472_v43 = vmul.f32 %v1155_v39, %v468_v41 }
 0x119   : > { %v476_v44 = vadd.f32 %v1156_v42, %v472_v43 }
 0x11b   : > { %1120 = vmatmul.msk.f32.vlgmr.msra.gmra.mxu0 %vm439_vm0, %v476_v44  ;;  %1121 = vmatmul.msk.f32.vlgmr.msra.gmra.mxu1 %vm439_vm0, %v476_v44 }
 0x198   : > { %v519_v48 = vpop.f32.mrf.mxu0  ;;  %v539_v49 = vpop.f32.mrf.mxu1 }
 0x199   : > { %v520_v50 = vadd.f32 %v519_v48, %v495_v46  ;;  %v1358_v51 = vadd.f32 %v539_v49, %v496_v47 }
 0x19b   : > { %607 = vmatpush.msra.mxu3 %v1358_v51  ;;  %612 = vrot.lane.b32.xlu0 %v520_v50, %s1196_s24 }
 0x19c   : > { %614 = vrot.lane.b32.xlu2 %v520_v50, %s1197_s28  ;;  %548 = vrot.lane.b32.xlu1 %v520_v50, %s1198_s29 }
 0x1a3   : > { %680 = vrot.lane.b32.xlu0 %v520_v50, %s1199_s30 }
 0x1a4   : > { %682 = vrot.lane.b32.xlu2 %v520_v50, %s1200_s14 }
 0x1ab   : > { %747 = vrot.lane.b32.xlu0 %v520_v50, %s1201_s15 }
 0x1f6   : > { %v615_v52 = vpop.permute.xlu2 %614 }
 0x1f7   : > { %1125 = vmatpush.xpose.msk.msrb.mxu3 %vm550_vm5, %v615_v52 }
 0x1fe   : > { %v683_v4 = vpop.permute.xlu2 %682 }
 0x20d   : > { %v613_v3 = vpop.permute.xlu0 %612 }
 0x20e   : > { %v549_v53 = vpop.permute.xlu1 %548 }
 0x20f   : > { %1122 = vmatpush.xpose.msk.msra.mxu2 %vm550_vm5, %v549_v53 }
 0x212   : > { %1123 = vmatmul.msk.f32.vlgmr.msra.gmra.mxu2 %vm550_vm5, %v520_v50 }
 0x215   : > { %v681_v6 = vpop.permute.xlu0 %680 }
 0x21d   : > { %v748_v11 = vpop.permute.xlu0 %747 }
 0x295   : > { %v572_v57 = vpop.f32.mrf.mxu2 }
 0x296   : > { %v575_v58 = vmul.f32 0.25, %v572_v57  ;;  %v836_v57 = vld [vmem:[%s1614_s5 + $0x28] sm:$0xff] }
 0x298   : > { %v576_v59 = vsel %vm546_vm6, %v575_v58, -1e+30  ;;  %v835_v58 = vld [vmem:[%s1614_s5 + $0x20] sm:$0xff] }
 0x299   : > { %v578_v60 = vsel %vm577_vm7, %v576_v59, -inf }
 0x29a   : > { %579 = vmax.xlane.f32.xlu1 %v578_v60  ;;  %v833_v60 = vld [vmem:[%s1614_s5 + $0x10] sm:$0xff] }
 0x30d   : > { %v580_v61 = vpop.xlane.xlu1 %579 }
 0x30e   : > { %v581_v62 = vsub.f32 %v576_v59, %v580_v61  ;;  %v834_v59 = vld [vmem:[%s1614_s5 + $0x18] sm:$0xff]  ;;  %v832_v61 = vld [vmem:[%s1614_s5 + $0x8] sm:$0xff] }
 0x310   : > { %v582_v63 = vmul.f32 1.442695, %v581_v62  ;;  %v831_v62 = vld [vmem:[%s1614_s5] sm:$0xff] }
 0x312   : > { %1165 = vpow2.f32 %v582_v63 }
 0x318   : > { %v1166_v1 = vpop.eup %1165 }
 0x319   : > { %v584_v2 = vsel %vm577_vm7, %v1166_v1, 0.0 }
 0x31a   : > { %585 = vadd.xlane.f32.xlu2 %v584_v2 }
 0x332   : > { %749 = vrot.lane.b32.xlu2 %v520_v50, %s1202_s16 }
 0x38d   : > { %v586_v5 = vpop.xlane.xlu2 %585 }
 0x38e   : > { %1167 = vrcp.f32 %v586_v5 }
 0x394   : > { %v1168_v7 = vpop.eup %1167 }
 0x395   : > { %v750_v9 = vpop.permute.xlu2 %749  ;;  %v588_v10 = vmul.f32 %v1168_v7, %v1166_v1 }
 0x396   : > { %1131 = vmatpush.xpose.msk.msrb.mxu0 %vm550_vm5, %v750_v9 }
 0x397   : > { %1124 = vmatmul.msk.f32.vlgmr.msra.gmra.mxu3 %vm577_vm7, %v588_v10 }
 0x398   : > { %1128 = vmatpush.xpose.msk.msra.mxu3 %vm550_vm5, %v683_v4 }
 0x399   : > { %1132 = vmatmul.msk.f32.vlgmr.msrb.gmra.mxu0 %vm550_vm5, %v748_v11 }
 0x39f   : > { %1126 = vmatmul.msk.f32.vlgmr.msrb.gmra.mxu3 %vm550_vm5, %v613_v3 }
 0x3a7   : > { %1129 = vmatmul.msk.f32.vlgmr.msra.gmra.mxu3 %vm550_vm5, %v681_v6  ;;  %v1157_v6 = vld [vmem:[%s1615_s6] ss:$0 sm:$0xff] }
 0x416   : > { %v772_v12 = vpop.f32.mrf.mxu0 }
 0x417   : > { %v775_v13 = vmul.f32 0.25, %v772_v12 }
 0x419   : > { %v776_v14 = vsel %vm546_vm6, %v775_v13, -1e+30 }
 0x41a   : > { %v1380_v15 = vpop.f32.mrf.mxu3  ;;  %v777_v16 = vsel %vm577_vm7, %v776_v14, -inf }
 0x41b   : > { %778 = vmax.xlane.f32.xlu0 %v777_v16 }
 0x422   : > { %v637_v17 = vpop.f32.mrf.mxu3 }
 0x423   : > { %v640_v18 = vmul.f32 0.25, %v637_v17  ;;  %v913_v17 = vld [vmem:[%s1618_s9 + $0x70] sm:$0xff] }
 0x425   : > { %v641_v19 = vsel %vm546_vm6, %v640_v18, -1e+30  ;;  %v911_v18 = vld [vmem:[%s1618_s9 + $0x60] sm:$0xff] }
 0x426   : > { %v642_v20 = vsel %vm577_vm7, %v641_v19, -inf }
 0x427   : > { %643 = vmax.xlane.f32.xlu2 %v642_v20  ;;  %v909_v20 = vld [vmem:[%s1618_s9 + $0x50] sm:$0xff] }
 0x42a   : > { %v705_v21 = vpop.f32.mrf.mxu3 }
 0x42b   : > { %v708_v22 = vmul.f32 0.25, %v705_v21  ;;  %v910_v21 = vld [vmem:[%s1618_s9 + $0x58] sm:$0xff] }
 0x42d   : > { %v709_v23 = vsel %vm546_vm6, %v708_v22, -1e+30  ;;  %v907_v22 = vld [vmem:[%s1618_s9 + $0x40] sm:$0xff] }
 0x42e   : > { %v710_v24 = vsel %vm577_vm7, %v709_v23, -inf }
 0x42f   : > { %711 = vmax.xlane.f32.xlu1 %v710_v24  ;;  %721 = vrot.lane.b32.xlu0 %v1358_v51, %s1199_s30  ;;  %v905_v24 = vld [vmem:[%s1618_s9 + $0x30] sm:$0xff] }
 0x48e   : > { %v779_v25 = vpop.xlane.xlu0 %778 }
 0x48f   : > { %v780_v26 = vsub.f32 %v776_v14, %v779_v25  ;;  %v906_v25 = vld [vmem:[%s1618_s9 + $0x38] sm:$0xff] }
 0x491   : > { %v781_v27 = vmul.f32 1.442695, %v780_v26  ;;  %v903_v26 = vld [vmem:[%s1618_s9 + $0x20] sm:$0xff] }
 0x493   : > { %1169 = vpow2.f32 %v781_v27  ;;  %v904_v27 = vld [vmem:[%s1618_s9 + $0x28] sm:$0xff] }
 0x499   : > { %v1170_v28 = vpop.eup %1169 }
 0x49a   : > { %v644_v29 = vpop.xlane.xlu2 %643  ;;  %v783_v30 = vsel %vm577_vm7, %v1170_v28, 0.0 }
 0x49b   : > { %v645_v31 = vsub.f32 %v641_v19, %v644_v29  ;;  %784 = vadd.xlane.f32.xlu2 %v783_v30  ;;  %v912_v19 = vld [vmem:[%s1618_s9 + $0x68] sm:$0xff]  ;;  %v902_v29 = vld [vmem:[%s1618_s9 + $0x18] sm:$0xff]  ;;  %v899_v30 = vld [vmem:[%s1618_s9] sm:$0xff] }
 0x49d   : > { %v646_v32 = vmul.f32 1.442695, %v645_v31  ;;  %v900_v31 = vld [vmem:[%s1618_s9 + $0x8] sm:$0xff] }
 0x49f   : > { %1171 = vpow2.f32 %v646_v32  ;;  %v1013_v32 = vld [vmem:[%s1620_s11 + $0xf8] sm:$0xff] }
 0x4a0   : > { %1038 = vmatpush.msrb.mxu3 %v1013_v32 }
 0x4a1   : > { %v722_v49 = vpop.permute.xlu0 %721 }
 0x4a2   : > { %v712_v33 = vpop.xlane.xlu1 %711 }
 0x4a3   : > { %v713_v34 = vsub.f32 %v709_v23, %v712_v33  ;;  %v908_v23 = vld [vmem:[%s1618_s9 + $0x48] sm:$0xff]  ;;  %v1012_v33 = vld [vmem:[%s1620_s11 + $0xf0] sm:$0xff] }
 0x4a4   : > { %1039 = vmatpush.msrb.mxu3 %v1012_v33 }
 0x4a5   : > { %v1172_v35 = vpop.eup %1171  ;;  %v714_v36 = vmul.f32 1.442695, %v713_v34  ;;  %v997_v34 = vld [vmem:[%s1620_s11 + $0x78] sm:$0xff] }
 0x4a6   : > { %v648_v37 = vsel %vm577_vm7, %v1172_v35, 0.0  ;;  %1018 = vmatpush.msrb.mxu1 %v997_v34 }
 0x4a7   : > { %1173 = vpow2.f32 %v714_v36  ;;  %649 = vadd.xlane.f32.xlu1 %v648_v37 }
 0x4ad   : > { %v1174_v38 = vpop.eup %1173 }
 0x4ae   : > { %v716_v39 = vsel %vm577_vm7, %v1174_v38, 0.0 }
 0x4af   : > { %717 = vadd.xlane.f32.xlu1 %v716_v39 }
 0x4b3   : > { %788 = vrot.lane.b32.xlu2 %v1358_v51, %s1201_s15  ;;  %s435_s15 = scalar_lea.vmem %s1622_s13, %s1118_s27 }
 0x4c8   : > { %654 = vrot.lane.b32.xlu1 %v1358_v51, %s1196_s24 }
 0x50e   : > { %v785_v40 = vpop.xlane.xlu2 %784 }
 0x50f   : > { %1175 = vrcp.f32 %v785_v40 }
 0x515   : > { %v1176_v41 = vpop.eup %1175 }
 0x516   : > { %v787_v42 = vmul.f32 %v1176_v41, %v1170_v28  ;;  %v789_v43 = vpop.permute.xlu2 %788  ;;  %v901_v28 = vld [vmem:[%s1618_s9 + $0x10] sm:$0xff] }
 0x517   : > { %809 = vmatpush.msra.mxu0 %v789_v43 }
 0x518   : > { %1133 = vmatmul.msk.f32.vlgmr.msra.gmra.mxu0 %vm577_vm7, %v787_v42 }
 0x51a   : > { %v650_v44 = vpop.xlane.xlu1 %649 }
 0x51b   : > { %1177 = vrcp.f32 %v650_v44 }
 0x521   : > { %v1178_v46 = vpop.eup %1177 }
 0x522   : > { %v718_v45 = vpop.xlane.xlu1 %717  ;;  %v652_v48 = vmul.f32 %v1178_v46, %v1172_v35  ;;  %v1011_v35 = vld [vmem:[%s1620_s11 + $0xe8] sm:$0xff] }
 0x523   : > { %1179 = vrcp.f32 %v718_v45  ;;  %1040 = vmatpush.msrb.mxu3 %v1011_v35 }
 0x529   : > { %v1180_v50 = vpop.eup %1179 }
 0x52a   : > { %v720_v51 = vmul.f32 %v1180_v50, %v1174_v38  ;;  %v1010_v38 = vld [vmem:[%s1620_s11 + $0xe0] sm:$0xff] }
 0x52b   : > { %1041 = vmatpush.msrb.mxu3 %v1010_v38 }
 0x53a   : > { %v655_v47 = vpop.permute.xlu1 %654 }
 0x53b   : > { %675 = vmatpush.msrb.mxu2 %v655_v47 }
 0x53c   : > { %1127 = vmatmul.msk.f32.vlgmr.msrb.gmra.mxu2 %vm577_vm7, %v652_v48  ;;  %v1159_v48 = vld [vmem:[%s1617_s8] ss:$0 sm:$0xff] }
 0x53d   : > { %742 = vmatpush.msra.mxu2 %v722_v49 }
 0x53f   : > { %854 = vmatpush.msrb.mxu2 %v838_v55  ;;  %v994_v55 = vld [vmem:[%s1620_s11 + $0x60] sm:$0xff] }
 0x541   : > { %855 = vmatpush.msrb.mxu2 %v837_v56  ;;  %v1007_v56 = vld [vmem:[%s1620_s11 + $0xc8] sm:$0xff] }
 0x543   : > { %856 = vmatpush.msrb.mxu2 %v836_v57  ;;  %v993_v57 = vld [vmem:[%s1620_s11 + $0x58] sm:$0xff] }
 0x544   : > { %1130 = vmatmul.msk.f32.vlgmr.msra.gmra.mxu2 %vm577_vm7, %v720_v51  ;;  %v996_v51 = vld [vmem:[%s1620_s11 + $0x70] sm:$0xff] }
 0x545   : > { %857 = vmatpush.msrb.mxu2 %v835_v58  ;;  %1019 = vmatpush.msrb.mxu1 %v996_v51  ;;  %v1006_v58 = vld [vmem:[%s1620_s11 + $0xc0] sm:$0xff] }
 0x547   : > { %858 = vmatpush.msrb.mxu2 %v834_v59  ;;  %v992_v59 = vld [vmem:[%s1620_s11 + $0x50] sm:$0xff] }
 0x549   : > { %859 = vmatpush.msrb.mxu2 %v833_v60  ;;  %v1005_v60 = vld [vmem:[%s1620_s11 + $0xb8] sm:$0xff] }
 0x54b   : > { %860 = vmatpush.msrb.mxu2 %v832_v61  ;;  %v991_v61 = vld [vmem:[%s1620_s11 + $0x48] sm:$0xff] }
 0x54d   : > { %861 = vmatpush.msrb.mxu2 %v831_v62  ;;  %v1004_v62 = vld [vmem:[%s1620_s11 + $0xb0] sm:$0xff] }
 0x54f   : > { %932 = vmatpush.msra.mxu2 %v913_v17  ;;  %v982_v17 = vld [vmem:[%s1620_s11] sm:$0xff] }
 0x551   : > { %933 = vmatpush.msra.mxu2 %v911_v18 }
 0x553   : > { %934 = vmatpush.msra.mxu2 %v909_v20 }
 0x555   : > { %935 = vmatpush.msra.mxu2 %v907_v22 }
 0x557   : > { %936 = vmatpush.msra.mxu2 %v905_v24 }
 0x559   : > { %937 = vmatpush.msra.mxu2 %v903_v26 }
 0x55b   : > { %938 = vmatpush.msra.mxu2 %v901_v28 }
 0x55d   : > { %939 = vmatpush.msra.mxu2 %v899_v30 }
 0x595   : > { %v811_v52 = vpop.f32.mrf.mxu0 }
 0x596   : > { %823 = vrot.lane.b32.xlu0 %v811_v52, %s1197_s28  ;;  %v1009_v52 = vld [vmem:[%s1620_s11 + $0xd8] sm:$0xff] }
 0x597   : > { %1042 = vmatpush.msrb.mxu3 %v1009_v52 }
 0x5bf   : > { %v677_v53 = vpop.f32.mrf.mxu2 }
 0x5c0   : > { %815 = vrot.lane.b32.xlu1 %v677_v53, %s1202_s16  ;;  %v995_v53 = vld [vmem:[%s1620_s11 + $0x68] sm:$0xff] }
 0x5c1   : > { %1020 = vmatpush.msrb.mxu1 %v995_v53 }
 0x5c3   : > { %1021 = vmatpush.msrb.mxu1 %v994_v55 }
 0x5c5   : > { %1022 = vmatpush.msrb.mxu1 %v993_v57 }
 0x5c7   : > { %v744_v54 = vpop.f32.mrf.mxu2  ;;  %1023 = vmatpush.msrb.mxu1 %v992_v59 }
 0x5c8   : > { %819 = vrot.lane.b32.xlu1 %v744_v54, %s1200_s14  ;;  %v1008_v54 = vld [vmem:[%s1620_s11 + $0xd0] sm:$0xff] }
 0x5c9   : > { %1043 = vmatpush.msrb.mxu3 %v1008_v54  ;;  %1024 = vmatpush.msrb.mxu1 %v991_v61 }
 0x5cb   : > { %1044 = vmatpush.msrb.mxu3 %v1007_v56 }
 0x5cd   : > { %1045 = vmatpush.msrb.mxu3 %v1006_v58 }
 0x5cf   : > { %1046 = vmatpush.msrb.mxu3 %v1005_v60 }
 0x5d1   : > { %1047 = vmatpush.msrb.mxu3 %v1004_v62 }
 0x608   : > { %v824_v3 = vpop.permute.xlu0 %823 }
 0x632   : > { %v816_v63 = vpop.permute.xlu1 %815 }
 0x633   : > { %v826_v1 = vsel %vm550_vm5, %v1380_v15, %v816_v63  ;;  %v990_v63 = vld [vmem:[%s1620_s11 + $0x40] sm:$0xff] }
 0x634   : > { %1025 = vmatpush.msrb.mxu1 %v990_v63 }
 0x63a   : > { %v820_v2 = vpop.permute.xlu1 %819 }
 0x63b   : > { %v828_v4 = vsel %vm827_vm8, %v826_v1, %v820_v2  ;;  %v1003_v1 = vld [vmem:[%s1620_s11 + $0xa8] sm:$0xff]  ;;  %v989_v2 = vld [vmem:[%s1620_s11 + $0x38] sm:$0xff] }
 0x63c   : > { %v830_v5 = vsel %vm829_vm9, %v828_v4, %v824_v3  ;;  %v1002_v3 = vld [vmem:[%s1620_s11 + $0xa0] sm:$0xff]  ;;  %1048 = vmatpush.msrb.mxu3 %v1003_v1  ;;  %v988_v4 = vld [vmem:[%s1620_s11 + $0x30] sm:$0xff]  ;;  %1026 = vmatpush.msrb.mxu1 %v989_v2 }
 0x63d   : > { %1134 = vmatmul.msk.f32.vlgmr.msrb.gmra.mxu2 %vm439_vm0, %v830_v5  ;;  %v1001_v5 = vld [vmem:[%s1620_s11 + $0x98] sm:$0xff] }
 0x63e   : > { %1049 = vmatpush.msrb.mxu3 %v1002_v3  ;;  %1027 = vmatpush.msrb.mxu1 %v988_v4 }
 0x640   : > { %1050 = vmatpush.msrb.mxu3 %v1001_v5 }
 0x6c0   : > { %v863_v7 = vpop.f32.mrf.mxu2 }
 0x6c1   : > { %v864_v9 = vadd.f32 %v1157_v6, %v863_v7  ;;  %v987_v6 = vld [vmem:[%s1620_s11 + $0x28] sm:$0xff]  ;;  %v1000_v7 = vld [vmem:[%s1620_s11 + $0x90] sm:$0xff] }
 0x6c2   : > { %1028 = vmatpush.msrb.mxu1 %v987_v6  ;;  %1051 = vmatpush.msrb.mxu3 %v1000_v7 }
 0x6c3   : > { %v1433_v10 = vadd.f32 %v864_v9, %v1289_v0  ;;  %v914_v0 = vld [vmem:[%s1618_s9 + $0x78] sm:$0xff]  ;;  %v986_v9 = vld [vmem:[%s1620_s11 + $0x20] sm:$0xff] }
 0x6c4   : > { %952 = vmatpush.msrb.mxu0 %v914_v0  ;;  %1029 = vmatpush.msrb.mxu1 %v986_v9 }
 0x6c5   : > { %v869_v11 = vsel %vm439_vm0, %v1433_v10, 0.0 }
 0x6c6   : > { %870 = vadd.xlane.f32.xlu1 %v869_v11  ;;  %953 = vmatpush.msrb.mxu0 %v912_v19  ;;  %v999_v11 = vld [vmem:[%s1620_s11 + $0x88] sm:$0xff] }
 0x6c7   : > { %1052 = vmatpush.msrb.mxu3 %v999_v11 }
 0x6c8   : > { %954 = vmatpush.msrb.mxu0 %v910_v21 }
 0x6ca   : > { %955 = vmatpush.msrb.mxu0 %v908_v23 }
 0x6cc   : > { %956 = vmatpush.msrb.mxu0 %v906_v25 }
 0x6ce   : > { %957 = vmatpush.msrb.mxu0 %v904_v27 }
 0x6d0   : > { %958 = vmatpush.msrb.mxu0 %v902_v29 }
 0x6d2   : > { %959 = vmatpush.msrb.mxu0 %v900_v31 }
 0x739   : > { %v871_v12 = vpop.xlane.xlu1 %870 }
 0x73a   : > { %v872_v13 = vmul.f32 %v871_v12, %v1293_v8  ;;  %v985_v12 = vld [vmem:[%s1620_s11 + $0x18] sm:$0xff] }
 0x73b   : > { %1030 = vmatpush.msrb.mxu1 %v985_v12 }
 0x73c   : > { %v873_v14 = vsub.f32 %v1433_v10, %v872_v13  ;;  %v998_v13 = vld [vmem:[%s1620_s11 + $0x80] sm:$0xff] }
 0x73d   : > { %1053 = vmatpush.msrb.mxu3 %v998_v13 }
 0x73e   : > { %v874_v15 = vmul.f32 %v873_v14, %v873_v14 }
 0x740   : > { %v875_v16 = vsel %vm439_vm0, %v874_v15, 0.0  ;;  %v983_v15 = vld [vmem:[%s1620_s11 + $0x8] sm:$0xff] }
 0x741   : > { %876 = vadd.xlane.f32.xlu2 %v875_v16  ;;  %v915_v16 = vld [vmem:[%s1619_s10] sm:$0x3] }
 0x742   : > { %v918_v0 = vperm.slane %v915_v16, 1  ;;  %v917_v21 = vperm.slane %v915_v16, 0 }
 0x7b4   : > { %v877_v36 = vpop.xlane.xlu2 %876 }
 0x7b5   : > { %v878_v37 = vmul.f32 %v877_v36, %v1293_v8  ;;  %v1158_v8 = vld [vmem:[%s1616_s7] ss:$0 sm:$0xff] }
 0x7b7   : > { %v879_v39 = vadd.f32 1e-05, %v878_v37 }
 0x7b9   : > { %1181 = vrsqrt.f32 %v879_v39  ;;  %vm886_vm11 = vweird.f32 %v879_v39 }
 0x7bf   : > { %v1182_v40 = vpop.eup %1181 }
 0x7c0   : > { %v881_v41 = vmul.f32 %v1182_v40, %v879_v39  ;;  %vm887_vm10 = vweird.f32 %v1182_v40 }
 0x7c1   : > { %vm888_vm12 = vmor %vm886_vm11, %vm887_vm10 }
 0x7c2   : > { %v882_v42 = vmul.f32 %v1182_v40, %v881_v41  ;;  %v1160_v41 = vld [vmem:[%s1621_s12] ss:$0 sm:$0xff] }
 0x7c4   : > { %v883_v43 = vmul.f32 0.5, %v882_v42 }
 0x7c6   : > { %v884_v44 = vsub.f32 1.5, %v883_v43 }
 0x7c8   : > { %v885_v45 = vmul.f32 %v1182_v40, %v884_v44 }
 0x7ca   : > { %v889_v46 = vsel %vm888_vm12, %v1182_v40, %v885_v45 }
 0x7cb   : > { %v890_v47 = vmul.f32 %v889_v46, %v873_v14  ;;  %v984_v14 = vld [vmem:[%s1620_s11 + $0x10] sm:$0xff] }
 0x7cc   : > { %1031 = vmatpush.msrb.mxu1 %v984_v14 }
 0x7cd   : > { %v894_v49 = vmul.f32 %v1158_v8, %v890_v47 }
 0x7ce   : > { %1032 = vmatpush.msrb.mxu1 %v983_v15 }
 0x7cf   : > { %v898_v50 = vadd.f32 %v1159_v48, %v894_v49 }
 0x7d0   : > { %1033 = vmatpush.msrb.mxu1 %v982_v17 }
 0x7d1   : > { %1135 = vmatmul.msk.f32.vlgmr.msra.gmra.mxu2 %vm439_vm0, %v898_v50  ;;  %1136 = vmatmul.msk.f32.vlgmr.msrb.gmra.mxu0 %vm439_vm0, %v898_v50 }
 0x84e   : > { %v961_v18 = vpop.f32.mrf.mxu0 }
 0x84f   : > { %v962_v19 = vadd.f32 %v961_v18, %v918_v0 }
 0x851   : > { %v967_v20 = vmul.f32 0.044715, %v962_v19  ;;  %v965_v34 = vmul.f32 0.5, %v962_v19 }
 0x853   : > { %v969_v22 = vmul.f32 %v967_v20, %v962_v19 }
 0x854   : > { %v941_v23 = vpop.f32.mrf.mxu2 }
 0x855   : > { %v971_v24 = vmul.f32 %v969_v22, %v962_v19  ;;  %v942_v25 = vadd.f32 %v941_v23, %v917_v21 }
 0x857   : > { %v966_v26 = vmul.f32 0.044715, %v942_v25  ;;  %v973_v27 = vadd.f32 %v971_v24, %v962_v19  ;;  %v964_v38 = vmul.f32 0.5, %v942_v25 }
 0x859   : > { %v975_v28 = vmul.f32 0.7978845, %v973_v27  ;;  %v968_v29 = vmul.f32 %v966_v26, %v942_v25 }
 0x85b   : > { %1183 = vtanh.f32 %v975_v28  ;;  %v970_v30 = vmul.f32 %v968_v29, %v942_v25 }
 0x85d   : > { %v972_v31 = vadd.f32 %v970_v30, %v942_v25 }
 0x85f   : > { %v974_v32 = vmul.f32 0.7978845, %v972_v31 }
 0x861   : > { %v1184_v33 = vpop.eup %1183  ;;  %1185 = vtanh.f32 %v974_v32 }
 0x862   : > { %v979_v35 = vadd.f32 1.0, %v1184_v33 }
 0x864   : > { %v981_v36 = vmul.f32 %v979_v35, %v965_v34 }
 0x866   : > { %1054 = vmatmul.f32.vlgmr.msrb.gmra.mxu3 %v981_v36 }
 0x867   : > { %v1186_v37 = vpop.eup %1185 }
 0x868   : > { %v978_v39 = vadd.f32 1.0, %v1186_v37 }
 0x86a   : > { %v980_v40 = vmul.f32 %v978_v39, %v964_v38 }
 0x86c   : > { %1034 = vmatmul.f32.vlgmr.msrb.gmra.mxu1 %v980_v40 }
 0x8e9   : > { %v1035_v42 = vpop.f32.mrf.mxu1  ;;  %v1055_v44 = vpop.f32.mrf.mxu3 }
 0x8ea   : > { %v1036_v43 = vadd.f32 %v1160_v41, %v1035_v42 }
 0x8ec   : > { %v1056_v45 = vadd.f32 %v1055_v44, %v1036_v43 }
 0x8ee   : > { %v1058_v8 = vadd.f32 %v1056_v45, %v1433_v10 }
 0x8f0   : > { %1059 = vst.msk [vmem:[%s435_s15] sm:$0xff] %vm439_vm0, %v1058_v8 }
 0x8f1 PF: > { %s23_s25 = sadd.s32 1, %s1193_s25  }
 0x8f2   : > { %p20_p4 = scmp.ge.s32.totalorder %s23_s25, 4  }
 0x8f4   :  { %22 = sbr.rel (!%p20_p4) target bundleno = 1 (0x1), region = 102 }

</bundles_post_ra>
